<compile_context>
chip_gen: v5e
topology: v5e:2x2
jax: 0.10.0
libtpu: 0.0.40
codegen_flags: <defaults>
</compile_context>

<pallas_src>
import functools

import jax
import jax.numpy as jnp
from jax.experimental import pallas as pl
from jax.experimental.pallas import tpu as pltpu


def _vmem_capacity_bytes():
    """Per-core VMEM capacity; conservative fallback (v7x per-TC) if unknown."""
    try:
        return int(pltpu.get_tpu_info().vmem_capacity_bytes)
    except Exception:
        return 64 << 20


def _pick_col_tile(T, h, b, *, bytes_per_col, budget, min_grid=4):
    """Choose the column tile (in (T, h)-flattened columns of one batch).

    Constraints:
      * col_tile = t * h with t | T  -> tiles start on h-run boundaries and
        contain whole runs (required for the roll-wraparound masking).
      * col_tile % 128 == 0 (lane-dense blocks) or col_tile == T*h.
      * working set (double-buffered in/out tiles + f32 intermediates) fits
        the generation-aware VMEM budget.
      * keep >= min_grid total grid steps when possible (>= 2 per v7x TC).
    Among feasible candidates, prefer the biggest tile (amortises the ~0.35 us
    per-grid-step overhead and lengthens DMAs toward the HBM roofline).
    """
    total = T * h
    cands = []
    for t in range(1, T + 1):
        if T % t:
            continue
        col = t * h
        if col % 128 == 0 or col == total:
            cands.append(col)
    if not cands:
        cands = [total]

    max_steps = b * (total // min(cands))
    need = min(min_grid, max_steps)

    def score(col):
        fits = col * bytes_per_col <= budget
        steps = b * (total // col)
        return (fits, steps >= need, col if fits else -col)

    return max(cands, key=score)


def _fsmn_kernel(x_ref, wlin_ref, blin_ref, wproj_ref, wconv_ref, o_ref, *,
                 lorder, h, mxu_dtype):
    # x_ref:     (1, c, M)  NCHW-native block (one batch, M = cols of (T, h))
    # wlin_ref:  (H, c)     W_lin (used as matmul LHS -> no transpose needed)
    # blin_ref:  (H, 1)
    # wproj_ref: (H, H)     W_proj
    # wconv_ref: (H, K)     depthwise taps (centre tap already has +1.0 folded)
    # o_ref:     (1, c, M)
    x = x_ref[0]                              # (c, M)
    xf = x.astype(jnp.float32)

    # Transposed-orientation MXU matmuls: f1^T = relu(W_lin @ x^T + b),
    # p1^T = W_proj @ f1^T.  Always accumulate in f32.
    f1 = jnp.maximum(
        jnp.dot(wlin_ref[...].astype(mxu_dtype), xf.astype(mxu_dtype),
                preferred_element_type=jnp.float32) + blin_ref[...],
        0.0,
    )
    p1 = jnp.dot(wproj_ref[...].astype(mxu_dtype), f1.astype(mxu_dtype),
                 preferred_element_type=jnp.float32)

    H, M = p1.shape
    K = 2 * lorder - 1
    pad = lorder - 1

    # Column index within each h-run.  Tiles contain only whole runs and start
    # on run boundaries, so local index == index within the run.
    cmod = jax.lax.broadcasted_iota(jnp.int32, (1, M), 1) % h

    wc = wconv_ref[...]                       # (H, K)
    # Centre tap (offset 0) — includes the folded "+ p1" residual.
    acc = p1 * wc[:, pad:pad + 1]
    for k in range(K):                        # small static unroll over taps
        d = k - pad
        if d == 0:
            continue
        # shifted[:, m] = p1[:, m + d]; wrap-around columns always correspond
        # to out-of-run taps and are zeroed by the mask below.
        shifted = pltpu.roll(p1, (-d) % M, axis=1)
        if d > 0:
            mk = (cmod < (h - d)).astype(jnp.float32)   # one compare on (1, M)
        else:
            mk = (cmod >= (-d)).astype(jnp.float32)
        acc = acc + (shifted * wc[:, k:k + 1]) * mk

    # out = x + p1 + conv   (p1 already folded into acc via the centre tap)
    o_ref[0] = (xf + acc).astype(o_ref.dtype)


def fsmn_wrap_forward(x, w_lin, b_lin, w_proj, w_conv, lorder, *,
                      mxu_dtype=jnp.float32):
    """FSMN_Wrap forward.  x: (b, c, T, h) NCHW -> (b, c, T, h).

    Output dtype follows x's dtype (bf16 x -> bf16 I/O with f32 accumulation).
    mxu_dtype=jnp.bfloat16 casts matmul operands (recommended on v5e).
    """
    b, c, T, h = x.shape
    H = w_lin.shape[0]
    assert w_lin.shape == (H, c) and c == H, "residual requires nIn == nHidden"
    K = 2 * lorder - 1
    pad = lorder - 1

    # NCHW-native layout: a free reshape, no HBM transpose round-trips.
    xr = x.reshape(b, c, T * h)

    wlin = jnp.asarray(w_lin, jnp.float32)                    # (H, c)
    blin = jnp.asarray(b_lin, jnp.float32).reshape(H, 1)      # (H, 1)
    wproj = jnp.asarray(w_proj, jnp.float32)                  # (H, H)
    wconv = jnp.asarray(w_conv, jnp.float32).reshape(H, K)    # (H, K)
    # Fold the "+ p1" residual into the centre tap.
    wconv = wconv.at[:, pad].add(1.0)

    in_isz = jnp.dtype(x.dtype).itemsize
    out_isz = in_isz

    # Generation-aware sizing: working-set budget ~45% of per-core VMEM
    # (v5e/v6e: ~57 MiB of 128; v7x: ~28 MiB of 64), scoped limit ~75%.
    vmem_cap = _vmem_capacity_bytes()
    weight_bytes = 2 * 4 * (H * c + H + H * H + H * K)        # double-buffered
    budget = max(int(vmem_cap * 0.45) - weight_bytes, 1)
    # Per-column bytes: double-buffered x/out tiles + ~6 f32 (H, M) temporaries.
    bytes_per_col = 2 * c * in_isz + 2 * c * out_isz + 6 * H * 4
    col_tile = _pick_col_tile(T, h, b, bytes_per_col=bytes_per_col,
                              budget=budget, min_grid=4)
    # Roll-wraparound masking requires tiles of whole h-runs on run boundaries.
    assert col_tile % h == 0 and (T * h) % col_tile == 0

    grid = (b, (T * h) // col_tile)
    vmem_limit = min(int(vmem_cap * 0.75), 96 << 20)

    kernel = functools.partial(_fsmn_kernel, lorder=lorder, h=h,
                               mxu_dtype=mxu_dtype)
    out = pl.pallas_call(
        kernel,
        grid=grid,
        in_specs=[
            pl.BlockSpec((1, c, col_tile), lambda bi, ci: (bi, 0, ci)),  # x
            pl.BlockSpec((H, c), lambda bi, ci: (0, 0)),   # resident weights
            pl.BlockSpec((H, 1), lambda bi, ci: (0, 0)),
            pl.BlockSpec((H, H), lambda bi, ci: (0, 0)),
            pl.BlockSpec((H, K), lambda bi, ci: (0, 0)),
        ],
        out_specs=pl.BlockSpec((1, c, col_tile), lambda bi, ci: (bi, 0, ci)),
        out_shape=jax.ShapeDtypeStruct((b, c, T * h), x.dtype),
        compiler_params=pltpu.CompilerParams(
            dimension_semantics=("parallel", "parallel"),
            vmem_limit_bytes=vmem_limit,
        ),
    )(xr, wlin, blin, wproj, wconv)

    return out.reshape(b, c, T, h)


def _reference(x, w_lin, b_lin, w_proj, w_conv, lorder):
    """Pure-JAX reference mirroring the PyTorch forward."""
    b, c, T, h = x.shape
    H = w_lin.shape[0]
    K = 2 * lorder - 1
    pad = lorder - 1
    xr = jnp.transpose(x, (0, 2, 3, 1)).reshape(b * T, h, c)
    f1 = jax.nn.relu(xr @ w_lin.T + b_lin)
    p1 = f1 @ w_proj.T
    pp = jnp.pad(p1, ((0, 0), (pad, pad), (0, 0)))
    wc = w_conv[:, 0, :, 0]  # (H, K)
    conv = jnp.zeros_like(p1)
    for k in range(K):
        conv = conv + pp[:, k:k + h, :] * wc[:, k][None, None, :]
    out = xr + p1 + conv
    return jnp.transpose(out.reshape(b, T, h, c), (0, 3, 1, 2))


if __name__ == "__main__":
    key = jax.random.PRNGKey(0)
    b, T, h = 2, 8, 16
    nIn = nHidden = 128        # module default; residual requires nIn == nHidden
    lorder = 3
    K = 2 * lorder - 1

    k1, k2, k3, k4, k5 = jax.random.split(key, 5)
    x = jax.random.normal(k1, (b, nIn, T, h), jnp.float32)
    # Deterministic synthetic parameters (shapes match the PyTorch module).
    w_lin = 0.1 * jax.random.normal(k2, (nHidden, nIn), jnp.float32)       # Linear(nIn, nHidden)
    b_lin = 0.1 * jax.random.normal(k3, (nHidden,), jnp.float32)
    w_proj = 0.1 * jax.random.normal(k4, (nHidden, nHidden), jnp.float32)  # Linear(nHidden, nHidden, bias=False)
    w_conv = 0.1 * jax.random.normal(k5, (nHidden, 1, K, 1), jnp.float32)  # depthwise Conv2d weight

    out = fsmn_wrap_forward(x, w_lin, b_lin, w_proj, w_conv, lorder)
    out = jax.block_until_ready(out)

    ref = _reference(x, w_lin, b_lin, w_proj, w_conv, lorder)
    assert out.shape == (b, nIn, T, h)
    assert jnp.allclose(out, ref, atol=5e-4, rtol=5e-4)
    print("KERNEL_OK")
</pallas_src>

<mosaic_0001>
module attributes {stable_mosaic.version = 11 : i64} {
  func.func @_fsmn_kernel(%arg0: i32, %arg1: i32, %arg2: memref<1x128x128xf32, #tpu.memory_space<vmem>>, %arg3: memref<128x128xf32, #tpu.memory_space<vmem>>, %arg4: memref<128x1xf32, #tpu.memory_space<vmem>>, %arg5: memref<128x128xf32, #tpu.memory_space<vmem>>, %arg6: memref<128x5xf32, #tpu.memory_space<vmem>>, %arg7: memref<1x128x128xf32, #tpu.memory_space<vmem>>) attributes {dimension_semantics = [#tpu.dimension_semantics<parallel>, #tpu.dimension_semantics<parallel>], iteration_bounds = array<i64: 2, 1>, scalar_prefetch = 0 : i64, scratch_operands = 0 : i64, tpu.core_type = #tpu.core_type<tc>, window_params = [{transform_indices = @transform_0, window_bounds = array<i64: 1, 128, 128>}, {pipeline_mode = #tpu.pipeline_mode<synchronous>, transform_indices = @transform_1, window_bounds = array<i64: 128, 128>}, {pipeline_mode = #tpu.pipeline_mode<synchronous>, transform_indices = @transform_2, window_bounds = array<i64: 128, 1>}, {pipeline_mode = #tpu.pipeline_mode<synchronous>, transform_indices = @transform_3, window_bounds = array<i64: 128, 128>}, {pipeline_mode = #tpu.pipeline_mode<synchronous>, transform_indices = @transform_4, window_bounds = array<i64: 128, 5>}, {transform_indices = @transform_5, window_bounds = array<i64: 1, 128, 128>}]} {
    %c0 = arith.constant 0 : index
    %c0_0 = arith.constant 0 : index
    %c0_1 = arith.constant 0 : index
    %0 = vector.load %arg2[%c0, %c0_0, %c0_1] : memref<1x128x128xf32, #tpu.memory_space<vmem>>, vector<1x128x128xf32>
    %1 = vector.shape_cast %0 : vector<1x128x128xf32> to vector<128x128xf32>
    %c0_2 = arith.constant 0 : index
    %c0_3 = arith.constant 0 : index
    %2 = vector.load %arg3[%c0_2, %c0_3] : memref<128x128xf32, #tpu.memory_space<vmem>>, vector<128x128xf32>
    %cst = arith.constant dense<0.000000e+00> : vector<128x128xf32>
    %3 = tpu.matmul %2, %1, %cst {dimension_numbers = #tpu.dot_dimension_numbers<[1], [0], [0], [1], [0, 0, 1, 1], [], []>} : vector<128x128xf32>, vector<128x128xf32>, vector<128x128xf32> -> vector<128x128xf32>
    %c0_4 = arith.constant 0 : index
    %c0_5 = arith.constant 0 : index
    %4 = vector.load %arg4[%c0_4, %c0_5] : memref<128x1xf32, #tpu.memory_space<vmem>>, vector<128x1xf32>
    %5 = vector.broadcast %4 : vector<128x1xf32> to vector<128x128xf32>
    %6 = arith.addf %3, %5 : vector<128x128xf32>
    %cst_6 = arith.constant 0.000000e+00 : f32
    %7 = vector.broadcast %cst_6 : f32 to vector<128x128xf32>
    %8 = arith.maximumf %6, %7 : vector<128x128xf32>
    %c0_7 = arith.constant 0 : index
    %c0_8 = arith.constant 0 : index
    %9 = vector.load %arg5[%c0_7, %c0_8] : memref<128x128xf32, #tpu.memory_space<vmem>>, vector<128x128xf32>
    %cst_9 = arith.constant dense<0.000000e+00> : vector<128x128xf32>
    %10 = tpu.matmul %9, %8, %cst_9 {dimension_numbers = #tpu.dot_dimension_numbers<[1], [0], [0], [1], [0, 0, 1, 1], [], []>} : vector<128x128xf32>, vector<128x128xf32>, vector<128x128xf32> -> vector<128x128xf32>
    %11 = tpu.iota {dimensions = array<i32: 1>} : vector<1x128xi32>
    %c16_i32 = arith.constant 16 : i32
    %c0_i32 = arith.constant 0 : i32
    %12 = arith.cmpi eq, %c16_i32, %c0_i32 : i32
    %c1_i32 = arith.constant 1 : i32
    %13 = arith.select %12, %c1_i32, %c16_i32 : i32
    %14 = vector.broadcast %13 : i32 to vector<1x128xi32>
    %15 = arith.remsi %11, %14 : vector<1x128xi32>
    %c0_i32_10 = arith.constant 0 : i32
    %16 = vector.broadcast %c0_i32_10 : i32 to vector<1x128xi32>
    %17 = arith.cmpi ne, %15, %16 : vector<1x128xi32>
    %c0_i32_11 = arith.constant 0 : i32
    %18 = vector.broadcast %c0_i32_11 : i32 to vector<1x128xi32>
    %19 = arith.cmpi slt, %15, %18 : vector<1x128xi32>
    %c0_i32_12 = arith.constant 0 : i32
    %20 = arith.cmpi slt, %13, %c0_i32_12 : i32
    %21 = vector.broadcast %20 : i1 to vector<1x128xi1>
    %22 = vector.broadcast %21 : vector<1x128xi1> to vector<1x128xi1>
    %23 = arith.xori %19, %22 : vector<1x128xi1>
    %24 = arith.andi %23, %17 : vector<1x128xi1>
    %25 = vector.broadcast %13 : i32 to vector<1x128xi32>
    %26 = arith.addi %15, %25 : vector<1x128xi32>
    %27 = arith.select %24, %26, %15 : vector<1x128xi1>, vector<1x128xi32>
    %c0_13 = arith.constant 0 : index
    %c0_14 = arith.constant 0 : index
    %28 = vector.load %arg6[%c0_13, %c0_14] : memref<128x5xf32, #tpu.memory_space<vmem>>, vector<128x5xf32>
    %29 = vector.extract_strided_slice %28 {offsets = [0, 2], sizes = [128, 1], strides = [1, 1]} : vector<128x5xf32> to vector<128x1xf32>
    %30 = vector.broadcast %29 : vector<128x1xf32> to vector<128x128xf32>
    %31 = arith.mulf %10, %30 : vector<128x128xf32>
    %c2_i32 = arith.constant 2 : i32
    %32 = tpu.dynamic_rotate %10 by %c2_i32 dim 1 : vector<128x128xf32>, i32 -> vector<128x128xf32>
    %c2_i32_15 = arith.constant 2 : i32
    %33 = vector.broadcast %c2_i32_15 : i32 to vector<1x128xi32>
    %34 = arith.cmpi sge, %27, %33 : vector<1x128xi32>
    %35 = arith.extui %34 : vector<1x128xi1> to vector<1x128xi32>
    %36 = arith.sitofp %35 : vector<1x128xi32> to vector<1x128xf32>
    %37 = vector.extract_strided_slice %28 {offsets = [0, 0], sizes = [128, 1], strides = [1, 1]} : vector<128x5xf32> to vector<128x1xf32>
    %38 = vector.broadcast %37 : vector<128x1xf32> to vector<128x128xf32>
    %39 = arith.mulf %32, %38 : vector<128x128xf32>
    %40 = vector.broadcast %36 : vector<1x128xf32> to vector<128x128xf32>
    %41 = arith.mulf %39, %40 : vector<128x128xf32>
    %42 = arith.addf %31, %41 : vector<128x128xf32>
    %c1_i32_16 = arith.constant 1 : i32
    %43 = tpu.dynamic_rotate %10 by %c1_i32_16 dim 1 : vector<128x128xf32>, i32 -> vector<128x128xf32>
    %c1_i32_17 = arith.constant 1 : i32
    %44 = vector.broadcast %c1_i32_17 : i32 to vector<1x128xi32>
    %45 = arith.cmpi sge, %27, %44 : vector<1x128xi32>
    %46 = arith.extui %45 : vector<1x128xi1> to vector<1x128xi32>
    %47 = arith.sitofp %46 : vector<1x128xi32> to vector<1x128xf32>
    %48 = vector.extract_strided_slice %28 {offsets = [0, 1], sizes = [128, 1], strides = [1, 1]} : vector<128x5xf32> to vector<128x1xf32>
    %49 = vector.broadcast %48 : vector<128x1xf32> to vector<128x128xf32>
    %50 = arith.mulf %43, %49 : vector<128x128xf32>
    %51 = vector.broadcast %47 : vector<1x128xf32> to vector<128x128xf32>
    %52 = arith.mulf %50, %51 : vector<128x128xf32>
    %53 = arith.addf %42, %52 : vector<128x128xf32>
    %c127_i32 = arith.constant 127 : i32
    %54 = tpu.dynamic_rotate %10 by %c127_i32 dim 1 : vector<128x128xf32>, i32 -> vector<128x128xf32>
    %c15_i32 = arith.constant 15 : i32
    %55 = vector.broadcast %c15_i32 : i32 to vector<1x128xi32>
    %56 = arith.cmpi slt, %27, %55 : vector<1x128xi32>
    %57 = arith.extui %56 : vector<1x128xi1> to vector<1x128xi32>
    %58 = arith.sitofp %57 : vector<1x128xi32> to vector<1x128xf32>
    %59 = vector.extract_strided_slice %28 {offsets = [0, 3], sizes = [128, 1], strides = [1, 1]} : vector<128x5xf32> to vector<128x1xf32>
    %60 = vector.broadcast %59 : vector<128x1xf32> to vector<128x128xf32>
    %61 = arith.mulf %54, %60 : vector<128x128xf32>
    %62 = vector.broadcast %58 : vector<1x128xf32> to vector<128x128xf32>
    %63 = arith.mulf %61, %62 : vector<128x128xf32>
    %64 = arith.addf %53, %63 : vector<128x128xf32>
    %c126_i32 = arith.constant 126 : i32
    %65 = tpu.dynamic_rotate %10 by %c126_i32 dim 1 : vector<128x128xf32>, i32 -> vector<128x128xf32>
    %c14_i32 = arith.constant 14 : i32
    %66 = vector.broadcast %c14_i32 : i32 to vector<1x128xi32>
    %67 = arith.cmpi slt, %27, %66 : vector<1x128xi32>
    %68 = arith.extui %67 : vector<1x128xi1> to vector<1x128xi32>
    %69 = arith.sitofp %68 : vector<1x128xi32> to vector<1x128xf32>
    %70 = vector.extract_strided_slice %28 {offsets = [0, 4], sizes = [128, 1], strides = [1, 1]} : vector<128x5xf32> to vector<128x1xf32>
    %71 = vector.broadcast %70 : vector<128x1xf32> to vector<128x128xf32>
    %72 = arith.mulf %65, %71 : vector<128x128xf32>
    %73 = vector.broadcast %69 : vector<1x128xf32> to vector<128x128xf32>
    %74 = arith.mulf %72, %73 : vector<128x128xf32>
    %75 = arith.addf %64, %74 : vector<128x128xf32>
    %76 = arith.addf %1, %75 : vector<128x128xf32>
    %c0_18 = arith.constant 0 : index
    %c0_19 = arith.constant 0 : index
    %c0_20 = arith.constant 0 : index
    %77 = vector.load %arg7[%c0_18, %c0_19, %c0_20] : memref<1x128x128xf32, #tpu.memory_space<vmem>>, vector<1x128x128xf32>
    %78 = vector.shape_cast %77 : vector<1x128x128xf32> to vector<128x128xf32>
    %79 = vector.shape_cast %76 : vector<128x128xf32> to vector<1x128x128xf32>
    tpu.vector_store %arg7[%c0_18, %c0_19, %c0_20], %79 {strides = array<i32>} : memref<1x128x128xf32, #tpu.memory_space<vmem>>, vector<1x128x128xf32>,
    return
  }
  func.func @transform_0(%arg0: i32, %arg1: i32) -> (i32, i32, i32) {
    %c0_i32 = arith.constant 0 : i32
    %c0_i32_0 = arith.constant 0 : i32
    return %arg0, %c0_i32, %arg1 : i32, i32, i32
  }
  func.func @transform_1(%arg0: i32, %arg1: i32) -> (i32, i32) {
    %c0_i32 = arith.constant 0 : i32
    %c0_i32_0 = arith.constant 0 : i32
    %c0_i32_1 = arith.constant 0 : i32
    return %c0_i32, %c0_i32_0 : i32, i32
  }
  func.func @transform_2(%arg0: i32, %arg1: i32) -> (i32, i32) {
    %c0_i32 = arith.constant 0 : i32
    %c0_i32_0 = arith.constant 0 : i32
    %c0_i32_1 = arith.constant 0 : i32
    return %c0_i32, %c0_i32_0 : i32, i32
  }
  func.func @transform_3(%arg0: i32, %arg1: i32) -> (i32, i32) {
    %c0_i32 = arith.constant 0 : i32
    %c0_i32_0 = arith.constant 0 : i32
    %c0_i32_1 = arith.constant 0 : i32
    return %c0_i32, %c0_i32_0 : i32, i32
  }
  func.func @transform_4(%arg0: i32, %arg1: i32) -> (i32, i32) {
    %c0_i32 = arith.constant 0 : i32
    %c0_i32_0 = arith.constant 0 : i32
    %c0_i32_1 = arith.constant 0 : i32
    return %c0_i32, %c0_i32_0 : i32, i32
  }
  func.func @transform_5(%arg0: i32, %arg1: i32) -> (i32, i32, i32) {
    %c0_i32 = arith.constant 0 : i32
    %c0_i32_0 = arith.constant 0 : i32
    return %arg0, %c0_i32, %arg1 : i32, i32, i32
  }
}

</mosaic_0001>

<bundles_post_ra>
// kernel: tpu_custom_call.1
= control target key start
LH: loop header
LB: loop body
LE: loop exit
PB: predicated region body
PF: predicated region fallthrough
CT: control target
= control target key end

     0   :  { %10 = vsyncpa [#allocation3], 0  ;;  %s2741_s0 = inlined_call_operand.vmem [shape: f32[2,128,128], index: 0, kind: input, shape index: {}]   ;;  %s2742_s1 = inlined_call_operand.hbm [shape: f32[128,128], index: 1, kind: input, shape index: {}]   ;;  %s2743_s2 = inlined_call_operand.vmem [shape: f32[128,1], index: 2, kind: input, shape index: {}]   ;;  %s2744_s3 = inlined_call_operand.hbm [shape: f32[128,128], index: 3, kind: input, shape index: {}]   ;;  %s2745_s4 = inlined_call_operand.vmem [shape: f32[128,5], index: 4, kind: input, shape index: {}]   ;;  %s2746_s5 = inlined_call_operand.hbm [shape: f32[2,128,128], index: 5, kind: output, shape index: {}]  }
   0x1   :  { %11 = vsyncpa [#allocation6], 0 }
   0x2   :  { %12 = vsyncpa [#allocation4], 0 }
   0x3   :  { %14 = vsyncpa [#allocation4 + $0x1], 0  ;;  %s1806_s18 = smov 0   ;;  %s1808_s19 = smov 0  }
   0x4   :  { %s1810_s20 = smov 0   ;;  %s1812_s21 = smov 0  }
   0x5   :  { %s1814_s22 = smov 0   ;;  %s1816_s23 = smov 0  }
   0x6 LB: > { %s1435_s24 = sadd.s32 4294967295, %s1758_s23   ;;  %s1436_s25 = sadd.s32 4294967294, %s1758_s23   ;;  %s1758_s23 = sphi %s1816_s23, %s20_s23   ;;  %s1754_s22 = sphi %s1814_s22, %s2846_s22   ;;  %s1750_s21 = sphi %s1812_s21, %s2845_s21   ;;  %s1746_s20 = sphi %s1810_s20, %s2844_s20   ;;  %s1742_s19 = sphi %s1808_s19, %s2843_s19   ;;  %s1738_s18 = sphi %s1806_s18, %s2842_s18  }
   0x7   : > { %s32_s26 = sadd.s32 1, %s1754_s22  ;;  %s153_s27 = sadd.s32 1, %s1746_s20 }
   0x8   : > { %p34_p0 = scmp.ge.s32.totalorder %s32_s26, 2  ;;  %p163_p1 = scmp.ne.s32.totalorder %s1746_s20, %s1742_s19 }
   0x9   : > { %p164_p2 = scmp.eq.s32.totalorder %s1435_s24, 1  ;;  %p169_p3 = scmp.ne.s32.totalorder %s1742_s19, %s1738_s18 }
   0xa   : > { %s2848_s26 = smov (%p34_p0, %s32_s26), 0  ;;  %p170_p5 = scmp.eq.s32.totalorder %s1436_s25, 1 }
   0xb   : > { %p1846_p4 = por %p164_p2, %p163_p1  ;;  %s148_s29 = ssub.s32 %s1754_s22, %s2848_s26 }
   0xc   : > { %p1437_p6 = scmp.ge.s32.totalorder %s1758_s23, 1  ;;  %p151_p7 = scmp.eq.s32.totalorder %s148_s29, 0 }
   0xd   : > { %p1853_p8 = por %p170_p5, %p169_p3  ;;  %p177_p9 = scmp.lt.s32.totalorder %s1758_s23, 3 }
   0xe   : > { %s1859_s6 = scalar_select %p151_p7, %s1746_s20, %s153_s27  }
   0xf   : > { %p1861_p10 = pnand %p1437_p6, %p177_p9  ;;  %p1865_p11 = scmp.eq.s32.totalorder %s1435_s24, 0 }
  0x10   : > { %s188_s11 = sshll.u32 %s2742_s1, 4  ;;  %s1760_s12 = smov [#allocation2]   ;;  %s189_s11 = int_to_ptr.hbm [resolvable:$true] %s188_s11 }
  0x11   : > { %p1500_p12 = pneg %p1861_p10  ;;  %s190_s13 = sshll.u32 %s1760_s12, 4  ;;  %s191_s13 = int_to_ptr.vmem [resolvable:$true] %s190_s13 }
  0x12   : > { %s205_s16 = sshll.u32 %s2744_s3, 4  ;;  %s1761_s17 = smov 128   ;;  %s206_s16 = int_to_ptr.hbm [resolvable:$true] %s205_s16 }
  0x13   : > { %p1501_p13 = pnand %p1865_p11, %p1500_p12  ;;  %s1762_s24 = smov 8  }
  0x14   : > { %s1763_s25 = smov [#allocation5]   ;;  %237 = sbr.rel (%p1861_p10) target bundleno = 734 (0x2de), region = 40 }
  0x15   : > { %1503 = dma.hbm_to_vmem [thread:$0]  (!%p1501_p13), %s189_s11, 2048, %s191_s13, [#allocation3], %s1761_s17, %s1761_s17, %s1762_s24  }
  0x16   : > { %s207_s27 = sshll.u32 %s1763_s25, 4  ;;  %s208_s27 = int_to_ptr.vmem [resolvable:$true] %s207_s27 }
  0x17   : > { %1506 = dma.hbm_to_vmem [thread:$0]  (!%p1501_p13), %s206_s16, 2048, %s208_s27, [#allocation6], %s1761_s17, %s1761_s17, %s1762_s24  }
  0x19   : > { %1725 = dma.done.wait (%p1865_p11), [#allocation3], 2048  }
  0x1a   : > { %1727 = vsyncadd (%p1865_p11), [#allocation3], 4294965248 }
  0x1b   : > { %1729 = dma.done.wait (%p1865_p11), [#allocation6], 2048  }
  0x1c   : > { %1731 = vsyncadd (%p1865_p11), [#allocation6], 4294965248  ;;  %p274_p0 = scmp.lt.s32.totalorder %s1750_s21, 1  ;;  %v1764_v0 = vmov 2   ;;  %v1900_v1 = vld [vmem:[%s2745_s4 + $0x10] sm:$0xff]  ;;  %v1765_v5 = vmov 0  }
  0x1d   : > { %1584 = vset.pattern.permute.xlu0 %v1764_v0  ;;  %1580 = vset.pattern.permute.xlu1 %v1765_v5  ;;  %v1912_v7 = vld [vmem:[%s2745_s4 + $0x38] sm:$0xff]  ;;  %v316_v10 = vld [vmem:[%s2743_s2 + $0x10] sm:$0xff]  ;;  %v1942_v19 = vld [vmem:[%s2745_s4 + $0x68] sm:$0xff]  ;;  %s1769_s25 = smov 2   ;;  %s1770_s27 = smov 1  }
  0x1e   : > { %s275_s29 = scalar_select %p274_p0, %s1750_s21, 1  ;;  %614 = vperm.xlu0 %1584, %v1900_v1   ;;  %1581 = vset.pattern.permute.xlu2 %v1765_v5  ;;  %v1927_v13 = vld [vmem:[%s2745_s4 + $0x50] sm:$0xff]  ;;  %v317_v16 = vld [vmem:[%s2743_s2 + $0x18] sm:$0xff]  ;;  %v318_v22 = vld [vmem:[%s2743_s2 + $0x20] sm:$0xff] }
  0x1f   : > { %342 = vperm.xlu1 %1580, %v316_v10   ;;  %v321_v23 = vld [vmem:[%s2743_s2 + $0x38] sm:$0xff]  ;;  %352 = vperm.xlu2 %1581, %v318_v22   ;;  %v298_v26 = vld [vmem:[#allocation2] sm:$0xff]  ;;  %v319_v29 = vld [vmem:[%s2743_s2 + $0x28] sm:$0xff]  ;;  %s271_s9 = sand.u32 1, %s1742_s19   ;;  %s1457_s14 = sshll.u32 %s1750_s21, 7 }
  0x20   : > { %s1456_s7 = sshll.u32 %s275_s29, 7  ;;  %v306_v27 = vld [vmem:[#allocation2 + $0x40] sm:$0xff]  ;;  %v324_v30 = vld [vmem:[%s2743_s2 + $0x50] sm:$0xff]  ;;  %v299_v31 = vld [vmem:[#allocation2 + $0x8] sm:$0xff]  ;;  %s1771_s29 = smov 127  }
  0x21   : > { %s1895_s11 = scalar_lea.vmem %s2741_s0, %s1456_s7  ;;  %v314_v28 = vld [vmem:[%s2743_s2] sm:$0xff]  ;;  %v307_v32 = vld [vmem:[#allocation2 + $0x48] sm:$0xff]  ;;  %v300_v36 = vld [vmem:[#allocation2 + $0x10] sm:$0xff]  ;;  %s1772_s7 = smov 126  }
  0x22   : > { %v297_v2 = vld [vmem:[%s1895_s11 + $0x78] sm:$0xff]  ;;  %v296_v3 = vld [vmem:[%s1895_s11 + $0x70] sm:$0xff]  ;;  %v295_v4 = vld [vmem:[%s1895_s11 + $0x68] sm:$0xff]  ;;  %s1444_s10 = sshll.u32 %s271_s9, 7  ;;  %s1331_s17 = scalar_lea.hbm %s2746_s5, %s1457_s14 }
  0x23   : > { %410 = vmatpush.msra.mxu0 %v297_v2  ;;  %1458 = vmatpush.msra.mxu2 %v297_v2  ;;  %v294_v6 = vld [vmem:[%s1895_s11 + $0x60] sm:$0xff]  ;;  %v293_v8 = vld [vmem:[%s1895_s11 + $0x58] sm:$0xff]  ;;  %v292_v9 = vld [vmem:[%s1895_s11 + $0x50] sm:$0xff]  ;;  %s2476_s12 = scalar_lea.vmem [#allocation7], %s1444_s10  ;;  %s1319_s21 = scalar_lea.sflag [#allocation4], %s271_s9 }
  0x24   : > { %v291_v11 = vld [vmem:[%s1895_s11 + $0x48] sm:$0xff]  ;;  %v1922_v12 = vld [vmem:[%s1895_s11 + $0x40] sm:$0xff]  ;;  %v289_v14 = vld [vmem:[%s1895_s11 + $0x38] sm:$0xff]  ;;  %s1332_s24 = sshll.u32 %s2476_s12, 4  ;;  %s1692_s13 = scalar_lea.hbm %s2746_s5, 256  ;;  %s1333_s24 = int_to_ptr.vmem [resolvable:$true] %s1332_s24 }
  0x25   : > { %411 = vmatpush.msra.mxu0 %v296_v3  ;;  %1459 = vmatpush.msra.mxu2 %v296_v3  ;;  %v288_v15 = vld [vmem:[%s1895_s11 + $0x30] sm:$0xff]  ;;  %v287_v17 = vld [vmem:[%s1895_s11 + $0x28] sm:$0xff]  ;;  %v286_v18 = vld [vmem:[%s1895_s11 + $0x20] sm:$0xff] }
  0x26   : > { %639 = vperm.xlu0 %1584, %v1912_v7   ;;  %v285_v20 = vld [vmem:[%s1895_s11 + $0x18] sm:$0xff]  ;;  %v284_v21 = vld [vmem:[%s1895_s11 + $0x10] sm:$0xff]  ;;  %v283_v24 = vld [vmem:[%s1895_s11 + $0x8] sm:$0xff] }
  0x27   : > { %412 = vmatpush.msra.mxu0 %v295_v4  ;;  %1460 = vmatpush.msra.mxu2 %v295_v4  ;;  %v1955_v25 = vld [vmem:[%s1895_s11] sm:$0xff]  ;;  %v315_v33 = vld [vmem:[%s2743_s2 + $0x8] sm:$0xff]  ;;  %v308_v37 = vld [vmem:[#allocation2 + $0x50] sm:$0xff] }
  0x28   : > { %347 = vperm.xlu1 %1580, %v317_v16   ;;  %357 = vperm.xlu2 %1581, %v319_v29   ;;  %v322_v34 = vld [vmem:[%s2743_s2 + $0x40] sm:$0xff]  ;;  %v327_v35 = vld [vmem:[%s2743_s2 + $0x68] sm:$0xff]  ;;  %v320_v38 = vld [vmem:[%s2743_s2 + $0x30] sm:$0xff] }
  0x29   : > { %413 = vmatpush.msra.mxu0 %v294_v6  ;;  %1461 = vmatpush.msra.mxu2 %v294_v6  ;;  %v301_v39 = vld [vmem:[#allocation2 + $0x18] sm:$0xff]  ;;  %v323_v41 = vld [vmem:[%s2743_s2 + $0x48] sm:$0xff]  ;;  %v302_v43 = vld [vmem:[#allocation2 + $0x20] sm:$0xff] }
  0x2a   : > { %v309_v40 = vld [vmem:[#allocation2 + $0x58] sm:$0xff]  ;;  %v310_v44 = vld [vmem:[#allocation2 + $0x60] sm:$0xff]  ;;  %v328_v46 = vld [vmem:[%s2743_s2 + $0x70] sm:$0xff] }
  0x2b   : > { %414 = vmatpush.msra.mxu0 %v293_v8  ;;  %1462 = vmatpush.msra.mxu2 %v293_v8  ;;  %v325_v42 = vld [vmem:[%s2743_s2 + $0x58] sm:$0xff]  ;;  %v326_v45 = vld [vmem:[%s2743_s2 + $0x60] sm:$0xff]  ;;  %v303_v47 = vld [vmem:[#allocation2 + $0x28] sm:$0xff] }
  0x2c   : > { %v311_v48 = vld [vmem:[#allocation2 + $0x68] sm:$0xff]  ;;  %v329_v49 = vld [vmem:[%s2743_s2 + $0x78] sm:$0xff]  ;;  %v304_v50 = vld [vmem:[#allocation2 + $0x30] sm:$0xff] }
  0x2d   : > { %415 = vmatpush.msra.mxu0 %v292_v9  ;;  %1463 = vmatpush.msra.mxu2 %v292_v9  ;;  %v312_v51 = vld [vmem:[#allocation2 + $0x70] sm:$0xff]  ;;  %v305_v52 = vld [vmem:[#allocation2 + $0x38] sm:$0xff]  ;;  %v2004_v54 = vld [vmem:[%s2745_s4] sm:$0xff] }
  0x2e   : > { %654 = vperm.xlu0 %1584, %v1927_v13   ;;  %v313_v53 = vld [vmem:[#allocation2 + $0x78] sm:$0xff]  ;;  %v2017_v56 = vld [vmem:[%s2745_s4 + $0x8] sm:$0xff]  ;;  %v2033_v60 = vld [vmem:[%s2745_s4 + $0x20] sm:$0xff] }
  0x2f   : > { %416 = vmatpush.msra.mxu0 %v291_v11  ;;  %1464 = vmatpush.msra.mxu2 %v291_v11  ;;  %v2011_v55 = vld [vmem:[%s2745_s4 + $0x18] sm:$0xff]  ;;  %v2022_v57 = vld [vmem:[%s2745_s4 + $0x28] sm:$0xff]  ;;  %v2039_v61 = vld [vmem:[%s2745_s4 + $0x40] sm:$0xff] }
  0x30   : > { %367 = vperm.xlu1 %1580, %v321_v23   ;;  %372 = vperm.xlu2 %1581, %v322_v34   ;;  %v2045_v62 = vld [vmem:[%s2745_s4 + $0x30] sm:$0xff]  ;;  %v2051_v63 = vld [vmem:[%s2745_s4 + $0x58] sm:$0xff]  ;;  %v2059_v2 = vld [vmem:[%s2745_s4 + $0x48] sm:$0xff]  ;;  %v1766_v34 = vmov 1  }
  0x31   : > { %417 = vmatpush.msra.mxu0 %v1922_v12  ;;  %1465 = vmatpush.msra.mxu2 %v1922_v12  ;;  %v2065_v3 = vld [vmem:[%s2745_s4 + $0x70] sm:$0xff]  ;;  %v2073_v6 = vld [vmem:[%s2745_s4 + $0x60] sm:$0xff]  ;;  %v2083_v11 = vld [vmem:[%s2745_s4 + $0x78] sm:$0xff] }
  0x33   : > { %418 = vmatpush.msra.mxu0 %v289_v14  ;;  %1466 = vmatpush.msra.mxu2 %v289_v14 }
  0x35   : > { %419 = vmatpush.msra.mxu0 %v288_v15  ;;  %1467 = vmatpush.msra.mxu2 %v288_v15 }
  0x36   : > { %669 = vperm.xlu0 %1584, %v1942_v19  }
  0x37   : > { %420 = vmatpush.msra.mxu0 %v287_v17  ;;  %1468 = vmatpush.msra.mxu2 %v287_v17 }
  0x38   : > { %382 = vperm.xlu1 %1580, %v324_v30   ;;  %387 = vperm.xlu2 %1581, %v325_v42  }
  0x39   : > { %421 = vmatpush.msra.mxu0 %v286_v18  ;;  %1469 = vmatpush.msra.mxu2 %v286_v18 }
  0x3b   : > { %422 = vmatpush.msra.mxu0 %v285_v20  ;;  %1470 = vmatpush.msra.mxu2 %v285_v20 }
  0x3d   : > { %423 = vmatpush.msra.mxu0 %v284_v21  ;;  %1471 = vmatpush.msra.mxu2 %v284_v21 }
  0x3e   : > { %1585 = vset.pattern.permute.xlu0 %v1765_v5 }
  0x3f   : > { %424 = vmatpush.msra.mxu0 %v283_v24  ;;  %1472 = vmatpush.msra.mxu2 %v283_v24 }
  0x40   : > { %332 = vperm.xlu0 %1585, %v314_v28   ;;  %397 = vperm.xlu1 %1580, %v327_v35  }
  0x41   : > { %425 = vmatpush.msra.mxu0 %v1955_v25  ;;  %1473 = vmatpush.msra.mxu2 %v1955_v25 }
  0x42   : > { %426 = vmatmul.f32.vlgmr.msra.gmra.mxu0 %v298_v26  ;;  %450 = vmatmul.f32.vlgmr.msra.gmra.mxu2 %v306_v27 }
  0x43   : > { %402 = vperm.xlu2 %1581, %v328_v46  }
  0x48   : > { %337 = vperm.xlu0 %1585, %v315_v33   ;;  %1582 = vset.pattern.permute.xlu1 %v1764_v0 }
  0x49   : > { %604 = vperm.xlu1 %1582, %v2004_v54  }
  0x4a   : > { %429 = vmatmul.f32.gmra.mxu0 %v299_v31  ;;  %453 = vmatmul.f32.gmra.mxu2 %v307_v32 }
  0x4b   : > { %1583 = vset.pattern.permute.xlu2 %v1764_v0 }
  0x4c   : > { %609 = vperm.xlu2 %1583, %v2017_v56  }
  0x50   : > { %362 = vperm.xlu0 %1585, %v320_v38  }
  0x51   : > { %619 = vperm.xlu1 %1582, %v2011_v55  }
  0x52   : > { %432 = vmatmul.f32.gmra.mxu0 %v300_v36  ;;  %456 = vmatmul.f32.gmra.mxu2 %v308_v37 }
  0x54   : > { %624 = vperm.xlu2 %1583, %v2033_v60  }
  0x58   : > { %377 = vperm.xlu0 %1585, %v323_v41  }
  0x59   : > { %629 = vperm.xlu1 %1582, %v2022_v57  }
  0x5a   : > { %435 = vmatmul.f32.gmra.mxu0 %v301_v39  ;;  %459 = vmatmul.f32.gmra.mxu2 %v309_v40 }
  0x5c   : > { %634 = vperm.xlu2 %1583, %v2045_v62  }
  0x60   : > { %392 = vperm.xlu0 %1585, %v326_v45  }
  0x61   : > { %644 = vperm.xlu1 %1582, %v2039_v61  }
  0x62   : > { %438 = vmatmul.f32.gmra.mxu0 %v302_v43  ;;  %462 = vmatmul.f32.gmra.mxu2 %v310_v44 }
  0x64   : > { %649 = vperm.xlu2 %1583, %v2059_v2  }
  0x68   : > { %407 = vperm.xlu0 %1585, %v329_v49  }
  0x69   : > { %659 = vperm.xlu1 %1582, %v2051_v63  }
  0x6a   : > { %441 = vmatmul.f32.gmra.mxu0 %v303_v47  ;;  %465 = vmatmul.f32.gmra.mxu2 %v311_v48 }
  0x6c   : > { %664 = vperm.xlu2 %1583, %v2073_v6  }
  0x70   : > { %742 = vperm.xlu0 %1585, %v1900_v1  }
  0x71   : > { %674 = vperm.xlu1 %1582, %v2065_v3  }
  0x72   : > { %444 = vmatmul.f32.gmra.mxu0 %v304_v50  ;;  %468 = vmatmul.f32.gmra.mxu2 %v312_v51 }
  0x74   : > { %679 = vperm.xlu2 %1583, %v2083_v11  }
  0x78   : > { %762 = vperm.xlu0 %1585, %v1912_v7  }
  0x79   : > { %1586 = vset.pattern.permute.xlu1 %v1765_v5  ;;  %v2089_v15 = vpop.permute.xlu2 %352 }
  0x7a   : > { %447 = vmatmul.f32.gmra.mxu0 %v305_v52  ;;  %471 = vmatmul.f32.gmra.mxu2 %v313_v53 }
  0x7b   : > { %734 = vperm.xlu1 %1586, %v2004_v54  }
  0x7c   : > { %1587 = vset.pattern.permute.xlu2 %v1765_v5 }
  0x7d   : > { %738 = vperm.xlu2 %1587, %v2017_v56  }
  0x80   : > { %774 = vperm.xlu0 %1585, %v1927_v13  }
  0x82   : > { %v2100_v20 = vpop.permute.xlu2 %357 }
  0x83   : > { %746 = vperm.xlu1 %1586, %v2011_v55  }
  0x85   : > { %750 = vperm.xlu2 %1587, %v2033_v60  }
  0x88   : > { %786 = vperm.xlu0 %1585, %v1942_v19  }
  0x8a   : > { %v2112_v24 = vpop.permute.xlu2 %372 }
  0x8b   : > { %754 = vperm.xlu1 %1586, %v2022_v57  }
  0x8d   : > { %758 = vperm.xlu2 %1587, %v2045_v62  }
  0x90   : > { %v2024_v58 = vpop.permute.xlu0 %614  ;;  %1590 = vset.pattern.permute.xlu0 %v1766_v34 }
  0x91   : > { %v2098_v18 = vpop.permute.xlu1 %342  ;;  %889 = vperm.xlu0 %1590, %v1900_v1  }
  0x92   : > { %v388_v30 = vpop.permute.xlu2 %387 }
  0x93   : > { %766 = vperm.xlu1 %1586, %v2039_v61  }
  0x95   : > { %770 = vperm.xlu2 %1587, %v2059_v2  }
  0x98   : > { %v2028_v59 = vpop.permute.xlu0 %639 }
  0x99   : > { %2754 = vst [vmem:[#allocation11_spill] sm:$0xff] %v2028_v59  ;;  %909 = vperm.xlu0 %1590, %v1912_v7  }
  0x9a   : > { %v2108_v23 = vpop.permute.xlu1 %347 }
  0x9b   : > { %778 = vperm.xlu1 %1586, %v2051_v63  }
  0x9d   : > { %782 = vperm.xlu2 %1587, %v2073_v6   ;;  %v403_v37 = vpop.permute.xlu2 %402 }
  0xa0   : > { %v2053_v0 = vpop.permute.xlu0 %654 }
  0xa1   : > { %921 = vperm.xlu0 %1590, %v1927_v13  }
  0xa2   : > { %v2118_v29 = vpop.permute.xlu1 %367 }
  0xa3   : > { %790 = vperm.xlu1 %1586, %v2065_v3  }
  0xa5   : > { %794 = vperm.xlu2 %1587, %v2083_v11  }
  0xa6   : > { %v2130_v42 = vpop.permute.xlu2 %609 }
  0xa8   : > { %v2068_v4 = vpop.permute.xlu0 %669 }
  0xa9   : > { %2755 = vst [vmem:[#allocation12_spill] sm:$0xff] %v2068_v4  ;;  %933 = vperm.xlu0 %1590, %v1942_v19  }
  0xaa   : > { %v383_v35 = vpop.permute.xlu1 %382 }
  0xab   : > { %1588 = vset.pattern.permute.xlu1 %v1766_v34 }
  0xac   : > { %881 = vperm.xlu1 %1588, %v2004_v54  }
  0xad   : > { %1589 = vset.pattern.permute.xlu2 %v1766_v34 }
  0xae   : > { %885 = vperm.xlu2 %1589, %v2017_v56   ;;  %v2137_v48 = vpop.permute.xlu2 %624 }
  0xaf   : > { %2756 = vst [vmem:[#allocation13_spill] sm:$0xff] %v2137_v48  ;;  %v1773_v48 = vmov 0.0  }
  0xb2   : > { %v333_v8 = vpop.permute.xlu0 %332  ;;  %v398_v39 = vpop.permute.xlu1 %397 }
  0xb4   : > { %893 = vperm.xlu1 %1588, %v2011_v55  }
  0xb6   : > { %897 = vperm.xlu2 %1589, %v2033_v60  }
  0xba   : > { %v2104_v21 = vpop.permute.xlu0 %337 }
  0xbb   : > { %v2134_v43 = vpop.permute.xlu1 %604 }
  0xbc   : > { %901 = vperm.xlu1 %1588, %v2022_v57  }
  0xbe   : > { %905 = vperm.xlu2 %1589, %v2045_v62  }
  0xbf   : > { %v427_v9 = vpop.f32.mrf.mxu0 }
  0xc0   : > { %v2078_v10 = vadd.f32 %v427_v9, %v333_v8 }
  0xc2   : > { %v2114_v27 = vpop.permute.xlu0 %362 }
  0xc3   : > { %v2141_v34 = vpop.permute.xlu1 %619 }
  0xc4   : > { %913 = vperm.xlu1 %1588, %v2039_v61   ;;  %2757 = vst [vmem:[#allocation14_spill] sm:$0xff] %v2141_v34 }
  0xc5   : > { %v2087_v14 = vpop.f32.mrf.mxu2 }
  0xc6   : > { %917 = vperm.xlu2 %1589, %v2059_v2  }
  0xc7   : > { %v2094_v16 = vpop.f32.mrf.mxu0 }
  0xca   : > { %v378_v32 = vpop.permute.xlu0 %377 }
  0xcc   : > { %925 = vperm.xlu1 %1588, %v2051_v63  }
  0xcd   : > { %v2096_v17 = vpop.f32.mrf.mxu2 }
  0xce   : > { %929 = vperm.xlu2 %1589, %v2073_v6  }
  0xcf   : > { %v2106_v5 = vpop.f32.mrf.mxu0 }
  0xd2   : > { %v393_v38 = vpop.permute.xlu0 %392 }
  0xd4   : > { %937 = vperm.xlu1 %1588, %v2065_v3  }
  0xd5   : > { %v457_v22 = vpop.f32.mrf.mxu2 }
  0xd6   : > { %941 = vperm.xlu2 %1589, %v2083_v11  }
  0xd7   : > { %v2116_v28 = vpop.f32.mrf.mxu0 }
  0xda   : > { %v408_v44 = vpop.permute.xlu0 %407 }
  0xdd   : > { %v460_v26 = vpop.f32.mrf.mxu2 }
  0xde   : > { %v461_v8 = vadd.f32 %v460_v26, %v388_v30  ;;  %v452_v30 = vadd.f32 %v2087_v14, %v2112_v24  ;;  %v2155_v14 = vpop.permute.xlu1 %629 }
  0xdf   : > { %v2123_v33 = vpop.f32.mrf.mxu0  ;;  %2759 = vst [vmem:[#allocation16_spill] sm:$0xff] %v2155_v14 }
  0xe5   : > { %v463_v31 = vpop.f32.mrf.mxu2 }
  0xe6   : > { %v464_v52 = vadd.f32 %v463_v31, %v393_v38  ;;  %v2144_v31 = vpop.permute.xlu2 %634  ;;  %v486_v38 = vmax.f32 %v461_v8, 0.0 }
  0xe7   : > { %v442_v40 = vpop.f32.mrf.mxu0  ;;  %2758 = vst [vmem:[#allocation15_spill] sm:$0xff] %v2144_v31 }
  0xe8   : > { %v443_v24 = vadd.f32 %v442_v40, %v2100_v20  ;;  %v434_v20 = vadd.f32 %v2106_v5, %v2098_v18  ;;  %v499_v5 = vld [vmem:[#allocation5 + $0x40] sm:$0xff] }
  0xed   : > { %v466_v36 = vpop.f32.mrf.mxu2 }
  0xee   : > { %v467_v50 = vadd.f32 %v466_v36, %v398_v39  ;;  %v455_v36 = vadd.f32 %v2096_v17, %v378_v32  ;;  %v483_v17 = vmax.f32 %v452_v30, 0.0 }
  0xef   : > { %v445_v49 = vpop.f32.mrf.mxu0 }
  0xf0   : > { %v488_v9 = vmax.f32 %v467_v50, 0.0  ;;  %v446_v32 = vadd.f32 %v445_v49, %v2114_v27  ;;  %v437_v27 = vadd.f32 %v2116_v28, %v2108_v23  ;;  %v2170_v23 = vpop.permute.xlu1 %644  ;;  %v477_v28 = vmax.f32 %v434_v20, 0.0  ;;  %v498_v20 = vld [vmem:[#allocation5 + $0x38] sm:$0xff] }
  0xf1   : > { %v1767_v50 = vmov 3  }
  0xf2   : > { %v478_v49 = vmax.f32 %v437_v27, 0.0  ;;  %1593 = vset.pattern.permute.xlu0 %v1767_v50  ;;  %1591 = vset.pattern.permute.xlu1 %v1767_v50  ;;  %v505_v27 = vld [vmem:[#allocation5 + $0x70] sm:$0xff] }
  0xf3   : > { %1036 = vperm.xlu0 %1593, %v1900_v1   ;;  %1028 = vperm.xlu1 %1591, %v2004_v54  }
  0xf4   : > { %1592 = vset.pattern.permute.xlu2 %v1767_v50 }
  0xf5   : > { %v469_v41 = vpop.f32.mrf.mxu2  ;;  %1032 = vperm.xlu2 %1592, %v2017_v56  }
  0xf6   : > { %v470_v46 = vadd.f32 %v469_v41, %v403_v37  ;;  %v458_v37 = vadd.f32 %v457_v22, %v383_v35  ;;  %v487_v41 = vmax.f32 %v464_v52, 0.0  ;;  %v484_v22 = vmax.f32 %v455_v36, 0.0 }
  0xf7   : > { %v448_v26 = vpop.f32.mrf.mxu0 }
  0xf8   : > { %v489_v53 = vmax.f32 %v470_v46, 0.0  ;;  %v485_v39 = vmax.f32 %v458_v37, 0.0  ;;  %v449_v35 = vadd.f32 %v448_v26, %v2118_v29  ;;  %v440_v29 = vadd.f32 %v2123_v33, %v2089_v15  ;;  %v2178_v52 = vpop.permute.xlu1 %659  ;;  %v493_v37 = vld [vmem:[#allocation5 + $0x10] sm:$0xff]  ;;  %v502_v26 = vld [vmem:[#allocation5 + $0x58] sm:$0xff] }
  0xf9   : > { %v481_v46 = vmax.f32 %v446_v32, 0.0  ;;  %v431_v33 = vadd.f32 %v2094_v16, %v2104_v21  ;;  %v475_v16 = vmax.f32 %v2078_v10, 0.0  ;;  %v491_v21 = vld [vmem:[#allocation5] sm:$0xff]  ;;  %v500_v10 = vld [vmem:[#allocation5 + $0x48] sm:$0xff] }
  0xfa   : > { %v479_v40 = vmax.f32 %v440_v29, 0.0 }
  0xfb   : > { %v476_v18 = vmax.f32 %v431_v33, 0.0  ;;  %1056 = vperm.xlu0 %1593, %v1912_v7   ;;  %1040 = vperm.xlu1 %1591, %v2011_v55  }
  0xfd   : > { %v472_v45 = vpop.f32.mrf.mxu2  ;;  %1044 = vperm.xlu2 %1592, %v2033_v60  }
  0xfe   : > { %v473_v47 = vadd.f32 %v472_v45, %v408_v44  ;;  %v2153_v44 = vpop.permute.xlu2 %649  ;;  %v482_v45 = vmax.f32 %v449_v35, 0.0  ;;  %v495_v35 = vld [vmem:[#allocation5 + $0x20] sm:$0xff] }
 0x100   : > { %v490_v51 = vmax.f32 %v473_v47, 0.0  ;;  %v480_v47 = vmax.f32 %v443_v24, 0.0  ;;  %v496_v24 = vld [vmem:[#allocation5 + $0x28] sm:$0xff] }
 0x102   : > { %507 = vmatpush.msra.mxu1 %v490_v51  ;;  %1474 = vmatpush.msra.mxu3 %v490_v51 }
 0x103   : > { %1068 = vperm.xlu0 %1593, %v1927_v13   ;;  %1048 = vperm.xlu1 %1591, %v2022_v57  }
 0x104   : > { %508 = vmatpush.msra.mxu1 %v489_v53  ;;  %1475 = vmatpush.msra.mxu3 %v489_v53  ;;  %v492_v53 = vld [vmem:[#allocation5 + $0x8] sm:$0xff] }
 0x105   : > { %1052 = vperm.xlu2 %1592, %v2045_v62  }
 0x106   : > { %509 = vmatpush.msra.mxu1 %v488_v9  ;;  %1476 = vmatpush.msra.mxu3 %v488_v9  ;;  %v2166_v15 = vpop.permute.xlu2 %664  ;;  %v2186_v9 = vpop.permute.xlu1 %674 }
 0x107   : > { %2760 = vst [vmem:[#allocation17_spill] sm:$0xff] %v2166_v15 }
 0x108   : > { %510 = vmatpush.msra.mxu1 %v487_v41  ;;  %1477 = vmatpush.msra.mxu3 %v487_v41  ;;  %2762 = vst [vmem:[#allocation19_spill] sm:$0xff] %v2186_v9  ;;  %v501_v41 = vld [vmem:[#allocation5 + $0x50] sm:$0xff] }
 0x10a   : > { %511 = vmatpush.msra.mxu1 %v486_v38  ;;  %1478 = vmatpush.msra.mxu3 %v486_v38  ;;  %v494_v38 = vld [vmem:[#allocation5 + $0x18] sm:$0xff] }
 0x10b   : > { %1080 = vperm.xlu0 %1593, %v1942_v19   ;;  %1060 = vperm.xlu1 %1591, %v2039_v61  }
 0x10c   : > { %512 = vmatpush.msra.mxu1 %v485_v39  ;;  %1479 = vmatpush.msra.mxu3 %v485_v39 }
 0x10d   : > { %1064 = vperm.xlu2 %1592, %v2059_v2  }
 0x10e   : > { %513 = vmatpush.msra.mxu1 %v484_v22  ;;  %1480 = vmatpush.msra.mxu3 %v484_v22  ;;  %v2175_v51 = vpop.permute.xlu2 %679  ;;  %v2196_v39 = vpop.permute.xlu1 %734  ;;  %v1768_v22 = vmov 4  }
 0x10f   : > { %2761 = vst [vmem:[#allocation18_spill] sm:$0xff] %v2175_v51 }
 0x110   : > { %514 = vmatpush.msra.mxu1 %v483_v17  ;;  %1481 = vmatpush.msra.mxu3 %v483_v17  ;;  %v503_v17 = vld [vmem:[#allocation5 + $0x60] sm:$0xff] }
 0x112   : > { %515 = vmatpush.msra.mxu1 %v482_v45  ;;  %1482 = vmatpush.msra.mxu3 %v482_v45  ;;  %v504_v45 = vld [vmem:[#allocation5 + $0x68] sm:$0xff] }
 0x113   : > { %1596 = vset.pattern.permute.xlu0 %v1768_v22  ;;  %1072 = vperm.xlu1 %1591, %v2051_v63  }
 0x114   : > { %516 = vmatpush.msra.mxu1 %v481_v46  ;;  %1483 = vmatpush.msra.mxu3 %v481_v46 }
 0x115   : > { %1183 = vperm.xlu0 %1596, %v1900_v1   ;;  %1076 = vperm.xlu2 %1592, %v2073_v6   ;;  %v497_v1 = vld [vmem:[#allocation5 + $0x30] sm:$0xff] }
 0x116   : > { %517 = vmatpush.msra.mxu1 %v480_v47  ;;  %1484 = vmatpush.msra.mxu3 %v480_v47  ;;  %v2182_v8 = vpop.permute.xlu2 %738  ;;  %v2204_v19 = vpop.permute.xlu1 %746 }
 0x118   : > { %518 = vmatpush.msra.mxu1 %v479_v40  ;;  %1485 = vmatpush.msra.mxu3 %v479_v40  ;;  %v506_v40 = vld [vmem:[#allocation5 + $0x78] sm:$0xff] }
 0x11a   : > { %519 = vmatpush.msra.mxu1 %v478_v49  ;;  %1486 = vmatpush.msra.mxu3 %v478_v49 }
 0x11b   : > { %1084 = vperm.xlu1 %1591, %v2065_v3  }
 0x11c   : > { %520 = vmatpush.msra.mxu1 %v477_v28  ;;  %1487 = vmatpush.msra.mxu3 %v477_v28 }
 0x11d   : > { %1203 = vperm.xlu0 %1596, %v1912_v7   ;;  %1088 = vperm.xlu2 %1592, %v2083_v11  }
 0x11e   : > { %521 = vmatpush.msra.mxu1 %v476_v18  ;;  %1488 = vmatpush.msra.mxu3 %v476_v18  ;;  %v2189_v36 = vpop.permute.xlu2 %750  ;;  %v2211_v46 = vpop.permute.xlu1 %754 }
 0x11f   : > { %2763 = vst [vmem:[#allocation20_spill] sm:$0xff] %v2189_v36 }
 0x120   : > { %522 = vmatpush.msra.mxu1 %v475_v16  ;;  %1489 = vmatpush.msra.mxu3 %v475_v16  ;;  %2766 = vst [vmem:[#allocation23_spill] sm:$0xff] %v2211_v46 }
 0x121   : > { %523 = vmatmul.f32.vlgmr.msra.gmra.mxu1 %v491_v21  ;;  %547 = vmatmul.f32.vlgmr.msra.gmra.mxu3 %v499_v5 }
 0x123   : > { %1594 = vset.pattern.permute.xlu1 %v1768_v22 }
 0x124   : > { %1175 = vperm.xlu1 %1594, %v2004_v54  }
 0x125   : > { %1215 = vperm.xlu0 %1596, %v1927_v13   ;;  %1595 = vset.pattern.permute.xlu2 %v1768_v22 }
 0x126   : > { %v2194_v30 = vpop.permute.xlu2 %758  ;;  %v2219_v7 = vpop.permute.xlu1 %766  ;;  %1179 = vperm.xlu2 %1595, %v2017_v56  }
 0x127   : > { %2764 = vst [vmem:[#allocation21_spill] sm:$0xff] %v2194_v30 }
 0x129   : > { %526 = vmatmul.f32.gmra.mxu1 %v492_v53  ;;  %550 = vmatmul.f32.gmra.mxu3 %v500_v10 }
 0x12c   : > { %1187 = vperm.xlu1 %1594, %v2011_v55  }
 0x12e   : > { %v2200_v32 = vpop.permute.xlu2 %770  ;;  %v2225_v13 = vpop.permute.xlu1 %778  ;;  %1191 = vperm.xlu2 %1595, %v2033_v60  }
 0x12f   : > { %v2248_v60 = vpop.permute.xlu0 %742 }
 0x131   : > { %529 = vmatmul.f32.gmra.mxu1 %v493_v37  ;;  %553 = vmatmul.f32.gmra.mxu3 %v501_v41 }
 0x134   : > { %1195 = vperm.xlu1 %1594, %v2022_v57  }
 0x136   : > { %v2207_v29 = vpop.permute.xlu2 %782  ;;  %v2232_v49 = vpop.permute.xlu1 %790  ;;  %1199 = vperm.xlu2 %1595, %v2045_v62  }
 0x137   : > { %2765 = vst [vmem:[#allocation22_spill] sm:$0xff] %v2207_v29  ;;  %v2254_v62 = vpop.permute.xlu0 %762 }
 0x138   : > { %2769 = vst [vmem:[#allocation26_spill] sm:$0xff] %v2232_v49 }
 0x139   : > { %532 = vmatmul.f32.gmra.mxu1 %v494_v38  ;;  %556 = vmatmul.f32.gmra.mxu3 %v502_v26  ;;  %2775 = vst [vmem:[#allocation32_spill] sm:$0xff] %v2254_v62 }
 0x13c   : > { %1207 = vperm.xlu1 %1594, %v2039_v61  }
 0x13e   : > { %v2214_v47 = vpop.permute.xlu2 %794  ;;  %v2238_v55 = vpop.permute.xlu1 %881  ;;  %1211 = vperm.xlu2 %1595, %v2059_v2  }
 0x13f   : > { %2767 = vst [vmem:[#allocation24_spill] sm:$0xff] %v2214_v47  ;;  %v2260_v21 = vpop.permute.xlu0 %774 }
 0x141   : > { %535 = vmatmul.f32.gmra.mxu1 %v495_v35  ;;  %559 = vmatmul.f32.gmra.mxu3 %v503_v17 }
 0x144   : > { %1219 = vperm.xlu1 %1594, %v2051_v63  }
 0x146   : > { %v2221_v33 = vpop.permute.xlu2 %885  ;;  %v2243_v50 = vpop.permute.xlu1 %893  ;;  %1223 = vperm.xlu2 %1595, %v2073_v6  }
 0x147   : > { %2771 = vst [vmem:[#allocation28_spill] sm:$0xff] %v2243_v50  ;;  %v2268_v6 = vpop.permute.xlu0 %786 }
 0x148   : > { %2777 = vst [vmem:[#allocation34_spill] sm:$0xff] %v2268_v6 }
 0x149   : > { %538 = vmatmul.f32.gmra.mxu1 %v496_v24  ;;  %562 = vmatmul.f32.gmra.mxu3 %v504_v45 }
 0x14e   : > { %v2227_v54 = vpop.permute.xlu2 %897  ;;  %v2250_v61 = vpop.permute.xlu1 %901 }
 0x14f   : > { %2768 = vst [vmem:[#allocation25_spill] sm:$0xff] %v2227_v54  ;;  %v2282_v26 = vpop.permute.xlu0 %889 }
 0x150   : > { %2773 = vst [vmem:[#allocation30_spill] sm:$0xff] %v2250_v61 }
 0x151   : > { %541 = vmatmul.f32.gmra.mxu1 %v497_v1  ;;  %565 = vmatmul.f32.gmra.mxu3 %v505_v27 }
 0x156   : > { %v2234_v28 = vpop.permute.xlu2 %905  ;;  %v2256_v63 = vpop.permute.xlu1 %913 }
 0x157   : > { %2770 = vst [vmem:[#allocation27_spill] sm:$0xff] %v2234_v28  ;;  %v2298_v17 = vpop.permute.xlu0 %909 }
 0x158   : > { %2780 = vst [vmem:[#allocation37_spill] sm:$0xff] %v2298_v17 }
 0x159   : > { %544 = vmatmul.f32.gmra.mxu1 %v498_v20  ;;  %568 = vmatmul.f32.gmra.mxu3 %v506_v40 }
 0x15e   : > { %v2240_v56 = vpop.permute.xlu2 %917  ;;  %v2262_v2 = vpop.permute.xlu1 %925 }
 0x15f   : > { %v2310_v1 = vpop.permute.xlu0 %921 }
 0x166   : > { %v2245_v57 = vpop.permute.xlu2 %929  ;;  %v2276_v37 = vpop.permute.xlu1 %937 }
 0x167   : > { %2772 = vst [vmem:[#allocation29_spill] sm:$0xff] %v2245_v57 }
 0x168   : > { %2778 = vst [vmem:[#allocation35_spill] sm:$0xff] %v2276_v37 }
 0x16e   : > { %v2252_v18 = vpop.permute.xlu2 %941  ;;  %v2294_v22 = vpop.permute.xlu1 %1028 }
 0x16f   : > { %2774 = vst [vmem:[#allocation31_spill] sm:$0xff] %v2252_v18  ;;  %v2326_v18 = vpop.permute.xlu0 %933 }
 0x170   : > { %2785 = vst [vmem:[#allocation42_spill] sm:$0xff] %v2326_v18 }
 0x176   : > { %v2258_v16 = vpop.permute.xlu2 %1032  ;;  %v2306_v24 = vpop.permute.xlu1 %1040 }
 0x177   : > { %2781 = vst [vmem:[#allocation38_spill] sm:$0xff] %v2306_v24  ;;  %v2342_v37 = vpop.permute.xlu0 %1036 }
 0x17e   : > { %v2264_v5 = vpop.permute.xlu2 %1044  ;;  %v2320_v20 = vpop.permute.xlu1 %1048 }
 0x17f   : > { %2776 = vst [vmem:[#allocation33_spill] sm:$0xff] %v2264_v5  ;;  %v2358_v17 = vpop.permute.xlu0 %1056 }
 0x180   : > { %2783 = vst [vmem:[#allocation40_spill] sm:$0xff] %v2320_v20 }
 0x181   : > { %2787 = vst [vmem:[#allocation44_spill] sm:$0xff] %v2358_v17 }
 0x186   : > { %v2278_v41 = vpop.permute.xlu2 %1052  ;;  %v2336_v9 = vpop.permute.xlu1 %1060 }
 0x187   : > { %2779 = vst [vmem:[#allocation36_spill] sm:$0xff] %v2278_v41  ;;  %v2372_v28 = vpop.permute.xlu0 %1068 }
 0x18e   : > { %v2296_v35 = vpop.permute.xlu2 %1064  ;;  %v2350_v49 = vpop.permute.xlu1 %1072 }
 0x196   : > { %v2308_v45 = vpop.permute.xlu2 %1076  ;;  %v2368_v31 = vpop.permute.xlu1 %1084 }
 0x197   : > { %2782 = vst [vmem:[#allocation39_spill] sm:$0xff] %v2308_v45 }
 0x198   : > { %2789 = vst [vmem:[#allocation46_spill] sm:$0xff] %v2368_v31 }
 0x19e   : > { %v2266_v53 = vpop.f32.mrf.mxu1  ;;  %v2322_v40 = vpop.permute.xlu2 %1088 }
 0x19f   : > { %698 = vrot.lane.b32.xlu0 %v2266_v53, %s1769_s25  ;;  %2784 = vst [vmem:[#allocation41_spill] sm:$0xff] %v2322_v40  ;;  %v2384_v15 = vpop.permute.xlu1 %1175 }
 0x1a4   : > { %v2272_v10 = vpop.f32.mrf.mxu3 }
 0x1a5   : > { %714 = vrot.lane.b32.xlu2 %v2272_v10, %s1769_s25 }
 0x1a6   : > { %v2280_v38 = vpop.f32.mrf.mxu1  ;;  %v2340_v40 = vpop.permute.xlu2 %1179 }
 0x1a7   : > { %845 = vrot.lane.b32.xlu0 %v2266_v53, %s1770_s27  ;;  %700 = vrot.lane.b32.xlu1 %v2280_v38, %s1769_s25  ;;  %v2396_v45 = vpop.permute.xlu1 %1187 }
 0x1a8   : > { %2793 = vst [vmem:[#allocation50_spill] sm:$0xff] %v2396_v45 }
 0x1ac   : > { %v2312_v27 = vpop.f32.mrf.mxu3 }
 0x1ad   : > { %861 = vrot.lane.b32.xlu2 %v2272_v10, %s1770_s27 }
 0x1ae   : > { %v2324_v51 = vpop.f32.mrf.mxu1  ;;  %v2356_v59 = vpop.permute.xlu2 %1191 }
 0x1af   : > { %992 = vrot.lane.b32.xlu0 %v2266_v53, %s1771_s29  ;;  %847 = vrot.lane.b32.xlu1 %v2280_v38, %s1770_s27  ;;  %2786 = vst [vmem:[#allocation43_spill] sm:$0xff] %v2356_v59  ;;  %v2410_v57 = vpop.permute.xlu1 %1195 }
 0x1b0   : > { %2796 = vst [vmem:[#allocation53_spill] sm:$0xff] %v2410_v57 }
 0x1b4   : > { %v2330_v47 = vpop.f32.mrf.mxu3 }
 0x1b5   : > { %1008 = vrot.lane.b32.xlu2 %v2272_v10, %s1771_s29 }
 0x1b6   : > { %v2360_v62 = vpop.f32.mrf.mxu1  ;;  %v2370_v41 = vpop.permute.xlu2 %1199 }
 0x1b7   : > { %1139 = vrot.lane.b32.xlu0 %v2266_v53, %s1772_s7  ;;  %994 = vrot.lane.b32.xlu1 %v2280_v38, %s1771_s29  ;;  %2788 = vst [vmem:[#allocation45_spill] sm:$0xff] %v2360_v62  ;;  %v1208_v20 = vpop.permute.xlu1 %1207 }
 0x1b8   : > { %2790 = vst [vmem:[#allocation47_spill] sm:$0xff] %v2370_v41  ;;  %v2388_v41 = vpop.permute.xlu0 %1080 }
 0x1b9   : > { %2792 = vst [vmem:[#allocation49_spill] sm:$0xff] %v2388_v41 }
 0x1bc   : > { %v2374_v30 = vpop.f32.mrf.mxu3 }
 0x1bd   : > { %1155 = vrot.lane.b32.xlu2 %v2272_v10, %s1772_s7 }
 0x1be   : > { %v2378_v17 = vpop.f32.mrf.mxu1  ;;  %v2386_v31 = vpop.permute.xlu2 %1211 }
 0x1bf   : > { %716 = vrot.lane.b32.xlu0 %v2312_v27, %s1769_s25  ;;  %1141 = vrot.lane.b32.xlu1 %v2280_v38, %s1772_s7  ;;  %2791 = vst [vmem:[#allocation48_spill] sm:$0xff] %v2378_v17  ;;  %v2444_v54 = vpop.permute.xlu1 %1219 }
 0x1c0   : > { %v2398_v18 = vpop.permute.xlu0 %1183 }
 0x1c4   : > { %v2408_v41 = vpop.f32.mrf.mxu3 }
 0x1c5   : > { %702 = vrot.lane.b32.xlu2 %v2324_v51, %s1769_s25  ;;  %2795 = vst [vmem:[#allocation52_spill] sm:$0xff] %v2408_v41 }
 0x1c6   : > { %v2402_v4 = vpop.permute.xlu2 %1223  ;;  %v2420_v14 = vpop.f32.mrf.mxu1 }
 0x1c7   : > { %863 = vrot.lane.b32.xlu0 %v2312_v27, %s1770_s27  ;;  %718 = vrot.lane.b32.xlu1 %v2330_v47, %s1769_s25  ;;  %2794 = vst [vmem:[#allocation51_spill] sm:$0xff] %v2402_v4  ;;  %v572_v4 = vlaneseq }
 0x1c8   : > { %v2414_v29 = vpop.permute.xlu0 %1203 }
 0x1c9   : > { %2797 = vst [vmem:[#allocation54_spill] sm:$0xff] %v2414_v29  ;;  %v573_v59 = vand.u32 127, %v572_v4 }
 0x1cb   : > { %v578_v29 = vand.u32 15, %v573_v59 }
 0x1cc   : > { %v2424_v57 = vpop.f32.mrf.mxu3 }
 0x1cd   : > { %849 = vrot.lane.b32.xlu2 %v2324_v51, %s1770_s27  ;;  %vm730_vm0 = vcmp.ge.s32.totalorder %v578_v29, 2  ;;  %vm877_vm1 = vcmp.ge.s32.totalorder %v578_v29, 1  ;;  %vm1024_vm2 = vcmp.lt.s32.totalorder %v578_v29, 15  ;;  %vm1171_vm3 = vcmp.lt.s32.totalorder %v578_v29, 14 }
 0x1ce   : > { %v2442_v45 = vsel %vm877_vm1, 1.0, %v1773_v48  ;;  %v2448_v34 = vsel %vm1024_vm2, 1.0, %v1773_v48  ;;  %v2457_v50 = vsel %vm1171_vm3, 1.0, %v1773_v48 }
 0x1cf   : > { %1010 = vrot.lane.b32.xlu0 %v2312_v27, %s1771_s29  ;;  %865 = vrot.lane.b32.xlu1 %v2330_v47, %s1770_s27 }
 0x1d0   : > { %v2430_v46 = vpop.permute.xlu0 %1215 }
 0x1d5   : > { %996 = vrot.lane.b32.xlu2 %v2324_v51, %s1771_s29 }
 0x1d7   : > { %1157 = vrot.lane.b32.xlu0 %v2312_v27, %s1772_s7  ;;  %1012 = vrot.lane.b32.xlu1 %v2330_v47, %s1771_s29 }
 0x1dd   : > { %1143 = vrot.lane.b32.xlu2 %v2324_v51, %s1772_s7 }
 0x1df   : > { %1159 = vrot.lane.b32.xlu1 %v2330_v47, %s1772_s7  ;;  %704 = vrot.lane.b32.xlu0 %v2360_v62, %s1769_s25 }
 0x1e5   : > { %720 = vrot.lane.b32.xlu2 %v2374_v30, %s1769_s25 }
 0x1e7   : > { %851 = vrot.lane.b32.xlu0 %v2360_v62, %s1770_s27  ;;  %706 = vrot.lane.b32.xlu1 %v2378_v17, %s1769_s25 }
 0x1ed   : > { %867 = vrot.lane.b32.xlu2 %v2374_v30, %s1770_s27 }
 0x1ef   : > { %998 = vrot.lane.b32.xlu0 %v2360_v62, %s1771_s29  ;;  %853 = vrot.lane.b32.xlu1 %v2378_v17, %s1770_s27 }
 0x1f5   : > { %1014 = vrot.lane.b32.xlu2 %v2374_v30, %s1771_s29 }
 0x1f7   : > { %1145 = vrot.lane.b32.xlu0 %v2360_v62, %s1772_s7  ;;  %1000 = vrot.lane.b32.xlu1 %v2378_v17, %s1771_s29  ;;  %v690_v62 = vmul.f32 %v2170_v23, %v2272_v10 }
 0x1fd   : > { %1161 = vrot.lane.b32.xlu2 %v2374_v30, %s1772_s7 }
 0x1ff   : > { %v715_v6 = vpop.permute.xlu2 %714  ;;  %722 = vrot.lane.b32.xlu0 %v2408_v41, %s1769_s25  ;;  %1147 = vrot.lane.b32.xlu1 %v2378_v17, %s1772_s7  ;;  %v2435_v17 = vsel %vm730_vm0, 1.0, %v1773_v48 }
 0x200   : > { %v805_v4 = vmul.f32 %v2219_v7, %v715_v6 }
 0x202   : > { %v821_v6 = vmul.f32 %v2435_v17, %v805_v4 }
 0x205   : > { %708 = vrot.lane.b32.xlu2 %v2420_v14, %s1769_s25 }
 0x207   : > { %v862_v61 = vpop.permute.xlu2 %861  ;;  %869 = vrot.lane.b32.xlu0 %v2408_v41, %s1770_s27  ;;  %724 = vrot.lane.b32.xlu1 %v2424_v57, %s1769_s25 }
 0x208   : > { %v952_v59 = vmul.f32 %v2256_v63, %v862_v61  ;;  %v837_v61 = vadd.f32 %v821_v6, %v690_v62 }
 0x20a   : > { %v968_v24 = vmul.f32 %v2442_v45, %v952_v59 }
 0x20c   : > { %v984_v23 = vadd.f32 %v968_v24, %v837_v61 }
 0x20d   : > { %855 = vrot.lane.b32.xlu2 %v2420_v14, %s1770_s27 }
 0x20f   : > { %v1009_v5 = vpop.permute.xlu2 %1008  ;;  %1016 = vrot.lane.b32.xlu0 %v2408_v41, %s1771_s29  ;;  %871 = vrot.lane.b32.xlu1 %v2424_v57, %s1770_s27 }
 0x210   : > { %v1099_v36 = vmul.f32 %v2336_v9, %v1009_v5 }
 0x211   : > { %v699_v7 = vpop.permute.xlu0 %698 }
 0x212   : > { %v1115_v63 = vmul.f32 %v2448_v34, %v1099_v36  ;;  %v2466_v36 = vpop.f32.mrf.mxu1  ;;  %v797_v24 = vmul.f32 %v2196_v39, %v699_v7  ;;  %v682_v39 = vmul.f32 %v2134_v43, %v2266_v53 }
 0x214   : > { %v1131_v10 = vadd.f32 %v1115_v63, %v984_v23 }
 0x215   : > { %1002 = vrot.lane.b32.xlu2 %v2420_v14, %s1771_s29 }
 0x217   : > { %v1156_v4 = vpop.permute.xlu2 %1155  ;;  %1163 = vrot.lane.b32.xlu0 %v2408_v41, %s1772_s7  ;;  %1018 = vrot.lane.b32.xlu1 %v2424_v57, %s1771_s29 }
 0x218   : > { %v1246_v9 = vmul.f32 %v1208_v20, %v1156_v4  ;;  %v2480_v4 = vpop.f32.mrf.mxu3 }
 0x219   : > { %v846_v5 = vpop.permute.xlu0 %845  ;;  %v701_v29 = vpop.permute.xlu1 %700 }
 0x21a   : > { %v1262_v62 = vmul.f32 %v2457_v50, %v1246_v9  ;;  %v944_v63 = vmul.f32 %v2238_v55, %v846_v5  ;;  %v2486_v9 = vpop.f32.mrf.mxu1 }
 0x21c   : > { %v1278_v48 = vadd.f32 %v1262_v62, %v1131_v10  ;;  %v960_v7 = vmul.f32 %v2442_v45, %v944_v63 }
 0x21d   : > { %1149 = vrot.lane.b32.xlu2 %v2420_v14, %s1772_s7 }
 0x21e   : > { %v1294_v59 = vadd.f32 %v1278_v48, %v1922_v12  ;;  %v813_v12 = vmul.f32 %v2435_v17, %v797_v24 }
 0x21f   : > { %v703_v6 = vpop.permute.xlu2 %702  ;;  %1165 = vrot.lane.b32.xlu1 %v2424_v57, %s1772_s7  ;;  %710 = vrot.lane.b32.xlu0 %v2466_v36, %s1769_s25 }
 0x220   : > { %1310 = vst [vmem:[%s2476_s12 + $0x40] sm:$0xff] %v1294_v59  ;;  %v829_v55 = vadd.f32 %v813_v12, %v682_v39 }
 0x221   : > { %v993_v20 = vpop.permute.xlu0 %992  ;;  %v848_v61 = vpop.permute.xlu1 %847 }
 0x222   : > { %v1091_v23 = vmul.f32 %v2294_v22, %v993_v20  ;;  %v798_v22 = vmul.f32 %v2182_v8, %v701_v29  ;;  %v976_v59 = vadd.f32 %v960_v7, %v829_v55  ;;  %v945_v24 = vmul.f32 %v2221_v33, %v848_v61 }
 0x223   : > { %v683_v8 = vmul.f32 %v2130_v42, %v2280_v38  ;;  %v799_v29 = vmul.f32 %v2248_v60, %v703_v6 }
 0x224   : > { %v1107_v5 = vmul.f32 %v2448_v34, %v1091_v23  ;;  %v814_v53 = vmul.f32 %v2435_v17, %v798_v22  ;;  %v961_v33 = vmul.f32 %v2442_v45, %v945_v24  ;;  %v684_v22 = vmul.f32 %v2024_v58, %v2324_v51  ;;  %v1597_v51 = vld [vmem:[%s1895_s11 + $0x8] sm:$0xff] }
 0x225   : > { %726 = vrot.lane.b32.xlu2 %v2480_v4, %s1769_s25  ;;  %v815_v60 = vmul.f32 %v2435_v17, %v799_v29 }
 0x226   : > { %v1123_v20 = vadd.f32 %v1107_v5, %v976_v59 }
 0x227   : > { %v850_v10 = vpop.permute.xlu2 %849  ;;  %857 = vrot.lane.b32.xlu0 %v2466_v36, %s1770_s27  ;;  %712 = vrot.lane.b32.xlu1 %v2486_v9, %s1769_s25 }
 0x228   : > { %v946_v12 = vmul.f32 %v2282_v26, %v850_v10 }
 0x229   : > { %v1140_v62 = vpop.permute.xlu0 %1139  ;;  %v995_v48 = vpop.permute.xlu1 %994 }
 0x22a   : > { %v1238_v43 = vmul.f32 %v2384_v15, %v1140_v62  ;;  %v1092_v41 = vmul.f32 %v2258_v16, %v995_v48  ;;  %v830_v16 = vadd.f32 %v814_v53, %v683_v8  ;;  %v962_v26 = vmul.f32 %v2442_v45, %v946_v12  ;;  %v1598_v8 = vld [vmem:[%s1895_s11 + $0x10] sm:$0xff] }
 0x22c   : > { %v1254_v63 = vmul.f32 %v2457_v50, %v1238_v43  ;;  %v1108_v39 = vmul.f32 %v2448_v34, %v1092_v41  ;;  %v977_v6 = vadd.f32 %v961_v33, %v830_v16  ;;  %v831_v41 = vadd.f32 %v815_v60, %v684_v22 }
 0x22d   : > { %873 = vrot.lane.b32.xlu2 %v2480_v4, %s1770_s27 }
 0x22e   : > { %v1270_v61 = vadd.f32 %v1254_v63, %v1123_v20  ;;  %v1124_v10 = vadd.f32 %v1108_v39, %v977_v6  ;;  %v978_v58 = vadd.f32 %v962_v26, %v831_v41  ;;  %v2536_v63 = vpop.f32.mrf.mxu3  ;;  %v691_v39 = vmul.f32 %v2153_v44, %v2312_v27 }
 0x22f   : > { %v997_v15 = vpop.permute.xlu2 %996  ;;  %1004 = vrot.lane.b32.xlu0 %v2466_v36, %s1771_s29  ;;  %859 = vrot.lane.b32.xlu1 %v2486_v9, %s1770_s27 }
 0x230   : > { %v1286_v23 = vadd.f32 %v1270_v61, %v1955_v25  ;;  %v1093_v7 = vmul.f32 %v2342_v37, %v997_v15 }
 0x231   : > { %v717_v42 = vpop.permute.xlu0 %716  ;;  %v1142_v38 = vpop.permute.xlu1 %1141 }
 0x232   : > { %1302 = vst [vmem:[%s2476_s12] sm:$0xff] %v1286_v23  ;;  %v1239_v55 = vmul.f32 %v2340_v40, %v1142_v38  ;;  %v1109_v5 = vmul.f32 %v2448_v34, %v1093_v7 }
 0x234   : > { %v1255_v25 = vmul.f32 %v2457_v50, %v1239_v55  ;;  %v1125_v43 = vadd.f32 %v1109_v5, %v978_v58  ;;  %v1599_v5 = vld [vmem:[%s1895_s11 + $0x48] sm:$0xff] }
 0x235   : > { %1020 = vrot.lane.b32.xlu2 %v2480_v4, %s1771_s29 }
 0x236   : > { %v1271_v62 = vadd.f32 %v1255_v25, %v1124_v10 }
 0x237   : > { %v1144_v37 = vpop.permute.xlu2 %1143  ;;  %1151 = vrot.lane.b32.xlu0 %v2466_v36, %s1772_s7  ;;  %1006 = vrot.lane.b32.xlu1 %v2486_v9, %s1771_s29 }
 0x238   : > { %v1287_v40 = vadd.f32 %v1597_v51, %v1271_v62  ;;  %v1240_v48 = vmul.f32 %v2398_v18, %v1144_v37  ;;  %v806_v18 = vmul.f32 %v2200_v32, %v717_v42 }
 0x239   : > { %v864_v59 = vpop.permute.xlu0 %863  ;;  %v719_v24 = vpop.permute.xlu1 %718 }
 0x23a   : > { %1303 = vst [vmem:[%s2476_s12 + $0x8] sm:$0xff] %v1287_v40  ;;  %v1256_v53 = vmul.f32 %v2457_v50, %v1240_v48  ;;  %v953_v16 = vmul.f32 %v2240_v56, %v864_v59  ;;  %v822_v12 = vmul.f32 %v2435_v17, %v806_v18  ;;  %v807_v56 = vmul.f32 %v2260_v21, %v719_v24 }
 0x23b   : > { %v692_v21 = vmul.f32 %v2053_v0, %v2330_v47  ;;  %v693_v40 = vmul.f32 %v2178_v52, %v2374_v30 }
 0x23c   : > { %v1272_v20 = vadd.f32 %v1256_v53, %v1125_v43  ;;  %v969_v38 = vmul.f32 %v2442_v45, %v953_v16  ;;  %v838_v32 = vadd.f32 %v822_v12, %v691_v39  ;;  %v823_v27 = vmul.f32 %v2435_v17, %v807_v56 }
 0x23d   : > { %1167 = vrot.lane.b32.xlu2 %v2480_v4, %s1772_s7 }
 0x23e   : > { %v1288_v29 = vadd.f32 %v1598_v8, %v1272_v20 }
 0x23f   : > { %v721_v33 = vpop.permute.xlu2 %720  ;;  %728 = vrot.lane.b32.xlu0 %v2536_v63, %s1769_s25  ;;  %1153 = vrot.lane.b32.xlu1 %v2486_v9, %s1772_s7  ;;  %s1334_s25 = sshll.u32 %s1331_s17, 4  ;;  %s1335_s25 = int_to_ptr.hbm [resolvable:$true] %s1334_s25 }
 0x240   : > { %1304 = vst [vmem:[%s2476_s12 + $0x10] sm:$0xff] %v1288_v29  ;;  %v808_v26 = vmul.f32 %v2225_v13, %v721_v33 }
 0x241   : > { %v1011_v61 = vpop.permute.xlu0 %1010  ;;  %v866_v15 = vpop.permute.xlu1 %865 }
 0x242   : > { %v1100_v23 = vmul.f32 %v2296_v35, %v1011_v61  ;;  %v954_v7 = vmul.f32 %v2310_v1, %v866_v15  ;;  %v824_v0 = vmul.f32 %v2435_v17, %v808_v26  ;;  %v1601_v15 = vld [vmem:[%s1895_s11 + $0x58] sm:$0xff] }
 0x244   : > { %v1116_v42 = vmul.f32 %v2448_v34, %v1100_v23  ;;  %v970_v10 = vmul.f32 %v2442_v45, %v954_v7  ;;  %v840_v24 = vadd.f32 %v824_v0, %v693_v40  ;;  %v1602_v23 = vld [vmem:[%s2745_s4 + $0x68] sm:$0xff] }
 0x245   : > { %1235 = vperm.xlu2 %1595, %v2083_v11   ;;  %v985_v11 = vadd.f32 %v969_v38, %v838_v32  ;;  %v2806_v0 = vld [vmem:[#allocation48_spill] sm:$0xff] }
 0x247   : > { %v868_v60 = vpop.permute.xlu2 %867  ;;  %875 = vrot.lane.b32.xlu0 %v2536_v63, %s1770_s27  ;;  %1231 = vperm.xlu1 %1594, %v2065_v3   ;;  %v1132_v55 = vadd.f32 %v1116_v42, %v985_v11  ;;  %v2799_v42 = vld [vmem:[#allocation38_spill] sm:$0xff]  ;;  %s1686_s27 = sshra.s32 %s1335_s25, 4  ;;  %s1687_s27 = int_to_ptr.hbm [resolvable:$true] %s1686_s27 }
 0x248   : > { %v955_v1 = vmul.f32 %v2262_v2, %v868_v60  ;;  %v2798_v60 = vld [vmem:[#allocation28_spill] sm:$0xff]  ;;  %v2801_v11 = vld [vmem:[#allocation14_spill] sm:$0xff]  ;;  %p1693_p5 = scmp.lt.s32.totalorder %s1687_s27, %s2746_s5 }
 0x249   : > { %v1158_v6 = vpop.permute.xlu0 %1157  ;;  %v1013_v35 = vpop.permute.xlu1 %1012 }
 0x24a   : > { %v1247_v44 = vmul.f32 %v2386_v31, %v1158_v6  ;;  %v1101_v3 = vmul.f32 %v2372_v28, %v1013_v35  ;;  %v839_v31 = vadd.f32 %v823_v27, %v692_v21  ;;  %v971_v2 = vmul.f32 %v2442_v45, %v955_v1  ;;  %v2800_v35 = vld [vmem:[#allocation45_spill] sm:$0xff] }
 0x24b   : > { %v685_v7 = vmul.f32 %v2801_v11, %v2800_v35  ;;  %v2813_v11 = vld [vmem:[#allocation53_spill] sm:$0xff] }
 0x24c   : > { %v1263_v22 = vmul.f32 %v2457_v50, %v1247_v44  ;;  %v1117_v28 = vmul.f32 %v2448_v34, %v1101_v3  ;;  %v986_v47 = vadd.f32 %v970_v10, %v839_v31  ;;  %v2804_v31 = vld [vmem:[#allocation50_spill] sm:$0xff] }
 0x24e   : > { %v1279_v25 = vadd.f32 %v1263_v22, %v1132_v55  ;;  %v1133_v48 = vadd.f32 %v1117_v28, %v986_v47  ;;  %v2802_v22 = vld [vmem:[#allocation20_spill] sm:$0xff]  ;;  %v2807_v47 = vld [vmem:[#allocation13_spill] sm:$0xff] }
 0x24f   : > { %v1015_v41 = vpop.permute.xlu2 %1014  ;;  %1022 = vrot.lane.b32.xlu0 %v2536_v63, %s1771_s29  ;;  %s1688_s29 = scalar_lea.hbm %s1687_s27, 128 }
 0x250   : > { %v1295_v62 = vadd.f32 %v1599_v5, %v1279_v25  ;;  %v1102_v13 = vmul.f32 %v2350_v49, %v1015_v41  ;;  %v987_v49 = vadd.f32 %v971_v2, %v840_v24  ;;  %v2803_v25 = vld [vmem:[#allocation25_spill] sm:$0xff]  ;;  %p1689_p1 = scmp.ne.s32.totalorder %s1687_s27, %s1688_s29  ;;  %p1694_p6 = scmp.lt.s32.totalorder %s1692_s13, %s1688_s29 }
 0x251   : > { %v1160_v37 = vpop.permute.xlu1 %1159  ;;  %v705_v58 = vpop.permute.xlu0 %704 }
 0x252   : > { %1311 = vst [vmem:[%s2476_s12 + $0x48] sm:$0xff] %v1295_v62  ;;  %v1248_v51 = vmul.f32 %v2430_v46, %v1160_v37  ;;  %v1118_v43 = vmul.f32 %v2448_v34, %v1102_v13  ;;  %v1600_v46 = vld [vmem:[%s1895_s11 + $0x50] sm:$0xff]  ;;  %v800_v39 = vmul.f32 %v2204_v19, %v705_v58  ;;  %v686_v13 = vmul.f32 %v2807_v47, %v2806_v0  ;;  %p1690_p2 = pnand %p1689_p1, %p1846_p4  ;;  %p1695_p7 = por %p1694_p6, %p1693_p5 }
 0x253   : > { %v2805_v37 = vld [vmem:[#allocation33_spill] sm:$0xff] }
 0x254   : > { %v1264_v59 = vmul.f32 %v2457_v50, %v1248_v51  ;;  %v1134_v33 = vadd.f32 %v1118_v43, %v987_v49  ;;  %v816_v56 = vmul.f32 %v2435_v17, %v800_v39  ;;  %v2808_v51 = vld [vmem:[#allocation23_spill] sm:$0xff]  ;;  %v2809_v43 = vld [vmem:[#allocation30_spill] sm:$0xff]  ;;  %p1691_p3 = pneg %p1690_p2 }
 0x256   : > { %v1280_v53 = vadd.f32 %v1264_v59, %v1133_v48  ;;  %v832_v55 = vadd.f32 %v816_v56, %v685_v7  ;;  %p1696_p9 = pnand %p1695_p7, %p1691_p3 }
 0x257   : > { %v1162_v20 = vpop.permute.xlu2 %1161  ;;  %1169 = vrot.lane.b32.xlu0 %v2536_v63, %s1772_s7 }
 0x258   : > { %v1296_v8 = vadd.f32 %v1600_v46, %v1280_v53  ;;  %v1249_v52 = vmul.f32 %v2444_v54, %v1162_v20  ;;  %v1603_v20 = vld [vmem:[%s1895_s11 + $0x18] sm:$0xff] }
 0x259   : > { %v852_v30 = vpop.permute.xlu0 %851  ;;  %v707_v29 = vpop.permute.xlu1 %706 }
 0x25a   : > { %1312 = vst [vmem:[%s2476_s12 + $0x50] sm:$0xff] %v1296_v8  ;;  %v1265_v18 = vmul.f32 %v2457_v50, %v1249_v52  ;;  %v947_v32 = vmul.f32 %v2798_v60, %v852_v30  ;;  %v801_v3 = vmul.f32 %v2802_v22, %v707_v29 }
 0x25c   : > { %v1281_v61 = vadd.f32 %v1265_v18, %v1134_v33  ;;  %v963_v44 = vmul.f32 %v2442_v45, %v947_v32  ;;  %v817_v5 = vmul.f32 %v2435_v17, %v801_v3  ;;  %v2810_v33 = vld [vmem:[#allocation40_spill] sm:$0xff]  ;;  %v2814_v3 = vld [vmem:[#allocation34_spill] sm:$0xff] }
 0x25e   : > { %v1297_v16 = vadd.f32 %v1601_v15, %v1281_v61  ;;  %v979_v10 = vadd.f32 %v963_v44, %v832_v55  ;;  %v833_v24 = vadd.f32 %v817_v5, %v686_v13  ;;  %v2811_v61 = vld [vmem:[#allocation43_spill] sm:$0xff]  ;;  %v2816_v5 = vld [vmem:[#allocation29_spill] sm:$0xff] }
 0x25f   : > { %v709_v12 = vpop.permute.xlu2 %708  ;;  %1227 = vperm.xlu0 %1596, %v1602_v23  }
 0x260   : > { %1313 = vst [vmem:[%s2476_s12 + $0x58] sm:$0xff] %v1297_v16  ;;  %v802_v40 = vmul.f32 %v2808_v51, %v709_v12  ;;  %v2812_v16 = vld [vmem:[#allocation16_spill] sm:$0xff]  ;;  %v2819_v51 = vld [vmem:[#allocation39_spill] sm:$0xff] }
 0x261   : > { %v999_v38 = vpop.permute.xlu0 %998  ;;  %v854_v54 = vpop.permute.xlu1 %853  ;;  %v687_v12 = vmul.f32 %v2812_v16, %v2420_v14 }
 0x262   : > { %v1094_v6 = vmul.f32 %v2799_v42, %v999_v38  ;;  %v948_v41 = vmul.f32 %v2803_v25, %v854_v54  ;;  %v818_v30 = vmul.f32 %v2435_v17, %v802_v40 }
 0x264   : > { %v1110_v19 = vmul.f32 %v2448_v34, %v1094_v6  ;;  %v964_v2 = vmul.f32 %v2442_v45, %v948_v41  ;;  %v834_v54 = vadd.f32 %v818_v30, %v687_v12  ;;  %v1604_v6 = vld [vmem:[%s1895_s11 + $0x20] sm:$0xff] }
 0x266   : > { %v1126_v62 = vadd.f32 %v1110_v19, %v979_v10  ;;  %v980_v29 = vadd.f32 %v964_v2, %v833_v24  ;;  %v2815_v10 = vld [vmem:[#allocation22_spill] sm:$0xff] }
 0x267   : > { %v856_v27 = vpop.permute.xlu2 %855 }
 0x268   : > { %v949_v53 = vmul.f32 %v2809_v43, %v856_v27 }
 0x269   : > { %v1146_v21 = vpop.permute.xlu0 %1145  ;;  %v1001_v26 = vpop.permute.xlu1 %1000 }
 0x26a   : > { %v1241_v1 = vmul.f32 %v2804_v31, %v1146_v21  ;;  %v1095_v58 = vmul.f32 %v2805_v37, %v1001_v26  ;;  %v965_v23 = vmul.f32 %v2442_v45, %v949_v53  ;;  %v1605_v21 = vld [vmem:[%s1895_s11 + $0x28] sm:$0xff] }
 0x26c   : > { %v1257_v28 = vmul.f32 %v2457_v50, %v1241_v1  ;;  %v1111_v46 = vmul.f32 %v2448_v34, %v1095_v58  ;;  %v981_v42 = vadd.f32 %v965_v23, %v834_v54  ;;  %v2818_v58 = vld [vmem:[#allocation42_spill] sm:$0xff]  ;;  %v1606_v23 = vld [vmem:[%s1895_s11 + $0x60] sm:$0xff] }
 0x26e   : > { %v1273_v48 = vadd.f32 %v1257_v28, %v1126_v62  ;;  %v1127_v39 = vadd.f32 %v1111_v46, %v980_v29  ;;  %v2817_v28 = vld [vmem:[#allocation12_spill] sm:$0xff]  ;;  %v2823_v29 = vld [vmem:[#allocation49_spill] sm:$0xff] }
 0x26f   : > { %v1003_v59 = vpop.permute.xlu2 %1002  ;;  %v695_v37 = vmul.f32 %v2817_v28, %v2424_v57 }
 0x270   : > { %v1289_v49 = vadd.f32 %v1603_v20, %v1273_v48  ;;  %v1096_v18 = vmul.f32 %v2810_v33, %v1003_v59  ;;  %v2820_v48 = vld [vmem:[#allocation52_spill] sm:$0xff]  ;;  %v2821_v59 = vld [vmem:[#allocation17_spill] sm:$0xff] }
 0x271   : > { %v723_v8 = vpop.permute.xlu0 %722  ;;  %v1148_v52 = vpop.permute.xlu1 %1147  ;;  %v694_v24 = vmul.f32 %v2821_v59, %v2820_v48 }
 0x272   : > { %1305 = vst [vmem:[%s2476_s12 + $0x18] sm:$0xff] %v1289_v49  ;;  %v1242_v15 = vmul.f32 %v2811_v61, %v1148_v52  ;;  %v1112_v60 = vmul.f32 %v2448_v34, %v1096_v18  ;;  %v809_v25 = vmul.f32 %v2815_v10, %v723_v8  ;;  %v2822_v52 = vld [vmem:[#allocation51_spill] sm:$0xff]  ;;  %v2828_v10 = vld [vmem:[#allocation32_spill] sm:$0xff] }
 0x274   : > { %v1258_v38 = vmul.f32 %v2457_v50, %v1242_v15  ;;  %v1128_v14 = vadd.f32 %v1112_v60, %v981_v42  ;;  %v825_v47 = vmul.f32 %v2435_v17, %v809_v25  ;;  %v2824_v42 = vld [vmem:[#allocation21_spill] sm:$0xff] }
 0x276   : > { %v1274_v32 = vadd.f32 %v1258_v38, %v1127_v39  ;;  %v841_v20 = vadd.f32 %v825_v47, %v694_v24 }
 0x277   : > { %v1150_v56 = vpop.permute.xlu2 %1149 }
 0x278   : > { %v1290_v35 = vadd.f32 %v1604_v6, %v1274_v32  ;;  %v1243_v7 = vmul.f32 %v2813_v11, %v1150_v56 }
 0x279   : > { %v870_v44 = vpop.permute.xlu0 %869  ;;  %v725_v27 = vpop.permute.xlu1 %724 }
 0x27a   : > { %1306 = vst [vmem:[%s2476_s12 + $0x20] sm:$0xff] %v1290_v35  ;;  %v1259_v55 = vmul.f32 %v2457_v50, %v1243_v7  ;;  %v810_v19 = vmul.f32 %v2814_v3, %v725_v27  ;;  %v956_v62 = vmul.f32 %v2816_v5, %v870_v44  ;;  %v2825_v7 = vld [vmem:[#allocation27_spill] sm:$0xff] }
 0x27b   : > { %v2827_v3 = vld [vmem:[#allocation15_spill] sm:$0xff] }
 0x27c   : > { %v1275_v22 = vadd.f32 %v1259_v55, %v1128_v14  ;;  %v826_v41 = vmul.f32 %v2435_v17, %v810_v19  ;;  %v972_v43 = vmul.f32 %v2442_v45, %v956_v62  ;;  %v2826_v55 = vld [vmem:[#allocation36_spill] sm:$0xff]  ;;  %v688_v19 = vmul.f32 %v2827_v3, %v2466_v36  ;;  %v2829_v62 = vld [vmem:[#allocation37_spill] sm:$0xff] }
 0x27e   : > { %v1291_v26 = vadd.f32 %v1605_v21, %v1275_v22  ;;  %v842_v13 = vadd.f32 %v826_v41, %v695_v37  ;;  %v988_v8 = vadd.f32 %v972_v43, %v841_v20  ;;  %v2830_v37 = vld [vmem:[#allocation47_spill] sm:$0xff]  ;;  %v2833_v43 = vld [vmem:[#allocation26_spill] sm:$0xff] }
 0x27f   : > { %v727_v56 = vpop.permute.xlu2 %726 }
 0x280   : > { %1307 = vst [vmem:[%s2476_s12 + $0x28] sm:$0xff] %v1291_v26 }
 0x281   : > { %v1017_v31 = vpop.permute.xlu0 %1016  ;;  %v872_v1 = vpop.permute.xlu1 %871 }
 0x282   : > { %v957_v0 = vmul.f32 %v2818_v58, %v872_v1  ;;  %v1103_v40 = vmul.f32 %v2819_v51, %v1017_v31 }
 0x284   : > { %v973_v2 = vmul.f32 %v2442_v45, %v957_v0  ;;  %v1119_v57 = vmul.f32 %v2448_v34, %v1103_v40  ;;  %v2832_v40 = vld [vmem:[#allocation11_spill] sm:$0xff] }
 0x286   : > { %v989_v53 = vadd.f32 %v973_v2, %v842_v13  ;;  %v1135_v18 = vadd.f32 %v1119_v57, %v988_v8  ;;  %v2831_v13 = vld [vmem:[#allocation44_spill] sm:$0xff]  ;;  %v689_v2 = vmul.f32 %v2832_v40, %v2486_v9  ;;  %v1607_v57 = vld [vmem:[%s1895_s11 + $0x30] sm:$0xff] }
 0x287   : > { %v874_v27 = vpop.permute.xlu2 %873 }
 0x289   : > { %v1164_v49 = vpop.permute.xlu0 %1163  ;;  %v1019_v46 = vpop.permute.xlu1 %1018 }
 0x28a   : > { %v1250_v30 = vmul.f32 %v2822_v52, %v1164_v49  ;;  %v1104_v33 = vmul.f32 %v2823_v29, %v1019_v46 }
 0x28c   : > { %v1266_v61 = vmul.f32 %v2457_v50, %v1250_v30  ;;  %v1120_v15 = vmul.f32 %v2448_v34, %v1104_v33  ;;  %v2834_v30 = vld [vmem:[#allocation35_spill] sm:$0xff] }
 0x28d   : > { %v958_v29 = vmul.f32 %v2834_v30, %v874_v27 }
 0x28e   : > { %v1282_v16 = vadd.f32 %v1266_v61, %v1135_v18  ;;  %v2645_v12 = vadd.f32 %v1120_v15, %v989_v53  ;;  %v811_v53 = vmul.f32 %v2833_v43, %v727_v56  ;;  %v2835_v18 = vld [vmem:[#allocation54_spill] sm:$0xff] }
 0x28f   : > { %v1021_v48 = vpop.permute.xlu2 %1020  ;;  %v2836_v15 = vld [vmem:[#allocation46_spill] sm:$0xff] }
 0x290   : > { %v1298_v39 = vadd.f32 %v1606_v23, %v1282_v16  ;;  %v827_v61 = vmul.f32 %v2435_v17, %v811_v53  ;;  %v1105_v16 = vmul.f32 %v2836_v15, %v1021_v48  ;;  %v1611_v53 = vld [vmem:[%s1895_s11 + $0x68] sm:$0xff] }
 0x291   : > { %v2648_v38 = vpop.permute.xlu1 %1165  ;;  %v711_v54 = vpop.permute.xlu0 %710 }
 0x292   : > { %1314 = vst [vmem:[%s2476_s12 + $0x60] sm:$0xff] %v1298_v39  ;;  %v803_v6 = vmul.f32 %v2824_v42, %v711_v54  ;;  %v2837_v54 = vld [vmem:[#allocation19_spill] sm:$0xff] }
 0x294   : > { %v819_v14 = vmul.f32 %v2435_v17, %v803_v6  ;;  %v1121_v6 = vmul.f32 %v2448_v34, %v1105_v16 }
 0x296   : > { %v835_v26 = vadd.f32 %v819_v14, %v688_v19  ;;  %v2838_v19 = vld [vmem:[#allocation24_spill] sm:$0xff] }
 0x299   : > { %v858_v60 = vpop.permute.xlu0 %857  ;;  %v713_v32 = vpop.permute.xlu1 %712 }
 0x29a   : > { %v950_v44 = vmul.f32 %v2825_v7, %v858_v60  ;;  %v804_v25 = vmul.f32 %v2828_v10, %v713_v32  ;;  %v696_v60 = vmul.f32 %v2837_v54, %v2480_v4  ;;  %v974_v32 = vmul.f32 %v2442_v45, %v958_v29 }
 0x29c   : > { %v966_v21 = vmul.f32 %v2442_v45, %v950_v44  ;;  %v820_v0 = vmul.f32 %v2435_v17, %v804_v25  ;;  %v843_v42 = vadd.f32 %v827_v61, %v696_v60 }
 0x29e   : > { %v982_v5 = vadd.f32 %v966_v21, %v835_v26  ;;  %v836_v20 = vadd.f32 %v820_v0, %v689_v2  ;;  %v990_v14 = vadd.f32 %v974_v32, %v843_v42  ;;  %v1609_v26 = vld [vmem:[%s1895_s11 + $0x70] sm:$0xff] }
 0x2a1   : > { %v1005_v35 = vpop.permute.xlu0 %1004  ;;  %v860_v11 = vpop.permute.xlu1 %859 }
 0x2a2   : > { %v1097_v22 = vmul.f32 %v2826_v55, %v1005_v35  ;;  %v951_v28 = vmul.f32 %v2829_v62, %v860_v11  ;;  %v1168_v35 = vpop.permute.xlu2 %1167  ;;  %v1608_v11 = vld [vmem:[%s1895_s11 + $0x38] sm:$0xff] }
 0x2a4   : > { %v1113_v41 = vmul.f32 %v2448_v34, %v1097_v22  ;;  %v967_v59 = vmul.f32 %v2442_v45, %v951_v28  ;;  %v1137_v22 = vadd.f32 %v1121_v6, %v990_v14  ;;  %v2841_v28 = vld [vmem:[#allocation18_spill] sm:$0xff] }
 0x2a6   : > { %v1129_v47 = vadd.f32 %v1113_v41, %v982_v5  ;;  %v983_v33 = vadd.f32 %v967_v59, %v836_v20  ;;  %v2839_v41 = vld [vmem:[#allocation31_spill] sm:$0xff]  ;;  %v2840_v5 = vld [vmem:[#allocation41_spill] sm:$0xff] }
 0x2a9   : > { %v1152_v31 = vpop.permute.xlu0 %1151  ;;  %v1007_v1 = vpop.permute.xlu1 %1006 }
 0x2aa   : > { %v1244_v58 = vmul.f32 %v2830_v37, %v1152_v31  ;;  %v1098_v51 = vmul.f32 %v2831_v13, %v1007_v1  ;;  %v697_v37 = vmul.f32 %v2841_v28, %v2536_v63  ;;  %v1610_v63 = vld [vmem:[%s1895_s11 + $0x78] sm:$0xff] }
 0x2ac   : > { %v1260_v36 = vmul.f32 %v2457_v50, %v1244_v58  ;;  %v1114_v46 = vmul.f32 %v2448_v34, %v1098_v51 }
 0x2ae   : > { %v1276_v24 = vadd.f32 %v1260_v36, %v1129_v47  ;;  %v1130_v23 = vadd.f32 %v1114_v46, %v983_v33  ;;  %v1236_v36 = vpop.permute.xlu2 %1235 }
 0x2b0   : > { %v1292_v49 = vadd.f32 %v1607_v57, %v1276_v24 }
 0x2b1   : > { %v729_v8 = vpop.permute.xlu0 %728  ;;  %v1154_v52 = vpop.permute.xlu1 %1153 }
 0x2b2   : > { %1308 = vst [vmem:[%s2476_s12 + $0x30] sm:$0xff] %v1292_v49  ;;  %v1245_v9 = vmul.f32 %v2835_v18, %v1154_v52  ;;  %v812_v21 = vmul.f32 %v2838_v19, %v729_v8 }
 0x2b4   : > { %v1261_v39 = vmul.f32 %v2457_v50, %v1245_v9  ;;  %v828_v1 = vmul.f32 %v2435_v17, %v812_v21 }
 0x2b6   : > { %v1277_v56 = vadd.f32 %v1261_v39, %v1130_v23  ;;  %v844_v0 = vadd.f32 %v828_v1, %v697_v37 }
 0x2b8   : > { %v1293_v7 = vadd.f32 %v1608_v11, %v1277_v56 }
 0x2b9   : > { %v876_v44 = vpop.permute.xlu0 %875  ;;  %v1232_v27 = vpop.permute.xlu1 %1231 }
 0x2ba   : > { %1309 = vst [vmem:[%s2476_s12 + $0x38] sm:$0xff] %v1293_v7  ;;  %v1252_v55 = vmul.f32 %v1232_v27, %v1168_v35  ;;  %v959_v31 = vmul.f32 %v2839_v41, %v876_v44 }
 0x2bc   : > { %v1268_v3 = vmul.f32 %v2457_v50, %v1252_v55  ;;  %v975_v58 = vmul.f32 %v2442_v45, %v959_v31 }
 0x2be   : > { %v1284_v4 = vadd.f32 %v1268_v3, %v1137_v22  ;;  %v991_v51 = vadd.f32 %v975_v58, %v844_v0 }
 0x2c0   : > { %v1300_v10 = vadd.f32 %v1609_v26, %v1284_v4 }
 0x2c1   : > { %v1023_v25 = vpop.permute.xlu0 %1022 }
 0x2c2   : > { %1316 = vst [vmem:[%s2476_s12 + $0x70] sm:$0xff] %v1300_v10  ;;  %v1106_v62 = vmul.f32 %v2840_v5, %v1023_v25 }
 0x2c4   : > { %v1122_v47 = vmul.f32 %v2448_v34, %v1106_v62 }
 0x2c6   : > { %v1138_v2 = vadd.f32 %v1122_v47, %v991_v51 }
 0x2c9   : > { %v1170_v13 = vpop.permute.xlu0 %1169 }
 0x2ca   : > { %v1253_v40 = vmul.f32 %v1236_v36, %v1170_v13 }
 0x2cc   : > { %v1269_v17 = vmul.f32 %v2457_v50, %v1253_v40 }
 0x2ce   : > { %v1285_v48 = vadd.f32 %v1269_v17, %v1138_v2 }
 0x2d0   : > { %v1301_v59 = vadd.f32 %v1610_v63, %v1285_v48 }
 0x2d1   : > { %v1228_v24 = vpop.permute.xlu0 %1227 }
 0x2d2   : > { %1317 = vst [vmem:[%s2476_s12 + $0x78] sm:$0xff] %v1301_v59  ;;  %v1251_v34 = vmul.f32 %v1228_v24, %v2648_v38 }
 0x2d4   : > { %v1267_v45 = vmul.f32 %v2457_v50, %v1251_v34 }
 0x2d6   : > { %v1283_v43 = vadd.f32 %v1267_v45, %v2645_v12 }
 0x2d8   : > { %v1299_v20 = vadd.f32 %v1611_v53, %v1283_v43 }
 0x2da   : > { %1315 = vst [vmem:[%s2476_s12 + $0x68] sm:$0xff] %v1299_v20 }
 0x2db   : > { %1699 = shalt.err (!%p1696_p9)
}
 0x2dc   : > { %s1774_s11 = smov 128   ;;  %s1775_s9 = smov 8  }
 0x2dd   : > { %1498 = dma.vmem_to_hbm [thread:$0]  (%p1846_p4), %s1333_s24, 2048, %s1335_s25, %s1319_s21, %s1774_s11, %s1774_s11, %s1775_s9  }
 0x2de PF: > { %p1515_p10 = scmp.ge.s32.totalorder %s1758_s23, 2  ;;  %s1349_s12 = sand.u32 1, %s1738_s18  }
 0x2df   : > { %s1350_s15 = scalar_lea.sflag [#allocation4], %s1349_s12 }
 0x2e0   : > { %p1508_p11 = pnand %p1515_p10, %p1853_p8 }
 0x2e2   : > { %p1509_p12 = pneg %p1508_p11 }
 0x2e4   : > { %1733 = dma.done.wait (%p1509_p12), %s1350_s15, 2048  }
 0x2e5   : > { %1735 = vsyncadd (%p1509_p12), %s1350_s15, 4294965248  ;;  %s20_s23 = sadd.s32 1, %s1758_s23   ;;  %s2842_s18 = smov %s1742_s19 }
 0x2e6   : > { %p17_p13 = scmp.ge.s32.totalorder %s20_s23, 4   ;;  %s2843_s19 = smov %s1746_s20 }
 0x2e7   : > { %s2844_s20 = smov %s1859_s6  ;;  %s2845_s21 = smov %s1754_s22 }
 0x2e8   : > { %s2846_s22 = smov %s2848_s26  ;;  %19 = sbr.rel (!%p17_p13) target bundleno = 6 (0x6), region = 84 }
 0x2ed   :  { %1356 = vsyncpa [#allocation3], 1 }
 0x2ee   :  { %1358 = vsyncpa [#allocation3 + $0x1], 1 }
 0x2ef   :  { %1359 = vsyncpa [#allocation6], 1 }
 0x2f0   :  { %1360 = vsyncpa [#allocation4], 1 }
 0x2f1   :  { %1362 = vsyncpa [#allocation4 + $0x1], 1 }

</bundles_post_ra>
